<compile_context>
chip_gen: v5e
topology: v5e:2x2
jax: 0.10.0
libtpu: 0.0.40
codegen_flags: <defaults>
</compile_context>

<pallas_src>
import functools
import math

import jax
import jax.numpy as jnp
import numpy as np
from jax import lax
from jax.experimental import pallas as pl
from jax.experimental.pallas import tpu as pltpu


# ---------------------------------------------------------------------------
# helpers
# ---------------------------------------------------------------------------
_VMEM_BUDGET = 40 * 1024 * 1024   # per-kernel working-set target (v7x: 64 MiB physical)
_VMEM_LIMIT = 56 * 1024 * 1024    # scoped VMEM limit handed to Mosaic


def _round_up(x, m):
    return (x + m - 1) // m * m


def _row_tiling(m, max_tile):
    """Pad M to a tile-friendly size and pick a row-tile size (multiple of 8)."""
    mp = _round_up(m, 8)
    if mp <= max_tile:
        return mp, mp
    mp = _round_up(m, max_tile)
    return mp, max_tile


def _pick_divisor_tile(extent, candidates):
    for t in candidates:
        if extent % t == 0:
            return t
    return candidates[-1]


def _im2col(x, kh, kw, stride, pad):
    """x: [N,H,W,C] -> patches [N*OH*OW, KH*KW*C] (pure data movement / XLA glue).

    # TODO(synk): replace with an implicit-GEMM (in-kernel patch gather via shifted
    # window index maps / manual DMA) to avoid the 16x HBM expansion of im2col.
    """
    n, h, w, c = x.shape
    xp = jnp.pad(x, ((0, 0), (pad, pad), (pad, pad), (0, 0)))
    oh = (h + 2 * pad - kh) // stride + 1
    ow = (w + 2 * pad - kw) // stride + 1
    cols = []
    for i in range(kh):
        for j in range(kw):
            cols.append(xp[:, i:i + stride * oh:stride, j:j + stride * ow:stride, :])
    patches = jnp.concatenate(cols, axis=-1)  # [N,OH,OW,KH*KW*C]
    return patches.reshape(n * oh * ow, kh * kw * c), (n, oh, ow)


# ---------------------------------------------------------------------------
# Pallas kernels
# ---------------------------------------------------------------------------
def _conv_matmul_kernel(*refs, apply_leaky, neg_slope, with_stats, with_bias, multi_k):
    """bf16 A @ bf16 B accumulated in f32; fused (optional) bias, LeakyReLU and
    per-column [sum, sum_sq] partials for BatchNorm.

    multi_k=False  -> 2-D grid, full-K weight slab resident in VMEM (weight-stationary).
    multi_k=True   -> 3-D grid with an f32 VMEM accumulator; k==0 writes the dot
                      directly (no zero-fill + add)."""
    idx = 0
    a_ref = refs[idx]; idx += 1
    b_ref = refs[idx]; idx += 1
    bias_ref = None
    if with_bias:
        bias_ref = refs[idx]; idx += 1
    o_ref = refs[idx]; idx += 1
    stats_ref = None
    if with_stats:
        stats_ref = refs[idx]; idx += 1
    acc_ref = refs[idx] if multi_k else None

    def epilogue(acc):
        y = acc
        if with_bias:
            y = y + bias_ref[...]
        if with_stats:
            s = jnp.sum(y, axis=0, keepdims=True)
            sq = jnp.sum(y * y, axis=0, keepdims=True)
            stats_ref[...] = jnp.concatenate([s, sq], axis=0)[None]   # (1, 2, tn)
        if apply_leaky:
            y = jnp.where(y >= 0, y, neg_slope * y)
        o_ref[...] = y.astype(o_ref.dtype)

    if multi_k:
        k = pl.program_id(2)

        @pl.when(k == 0)
        def _():
            acc_ref[...] = jnp.dot(a_ref[...], b_ref[...],
                                   preferred_element_type=jnp.float32)

        @pl.when(k > 0)
        def _():
            acc_ref[...] += jnp.dot(a_ref[...], b_ref[...],
                                    preferred_element_type=jnp.float32)

        @pl.when(k == pl.num_programs(2) - 1)
        def _():
            epilogue(acc_ref[...])
    else:
        epilogue(jnp.dot(a_ref[...], b_ref[...],
                         preferred_element_type=jnp.float32))


def _bn_leaky_kernel(x_ref, scale_ref, shift_ref, o_ref, *, neg_slope):
    y = x_ref[...].astype(jnp.float32) * scale_ref[...] + shift_ref[...]
    o_ref[...] = jnp.where(y >= 0, y, neg_slope * y).astype(o_ref.dtype)


# ---------------------------------------------------------------------------
# Pallas wrappers
# ---------------------------------------------------------------------------
def conv_matmul(a, b, bias=None, *, apply_leaky, with_stats,
                out_dtype=jnp.float32, neg_slope=0.2, return_padded=False):
    """y = a:[M,K] @ b:[K,N] (+ bias[N]) with optionally fused LeakyReLU.

    MXU inputs are bf16; accumulation and epilogue math are f32.
    If with_stats, also returns f32 [2, N] = per-column [sum, sum_sq] of the
    pre-activation output (padded rows contribute 0 because bias is disallowed).
    If return_padded, the output keeps its (row-mult-of-8, col-mult-of-128) padding.
    """
    m, k = a.shape
    k2, n = b.shape
    assert k == k2
    with_bias = bias is not None
    # Fused stats sum over padded rows; those rows are exactly 0 only without bias.
    assert not (with_stats and with_bias), "with_stats requires bias=None"

    out_bytes = jnp.dtype(out_dtype).itemsize

    # ---- tile selection ----------------------------------------------------
    np_ = _round_up(n, 128)
    tn = _pick_divisor_tile(np_, (512, 256, 128))     # full-N tile whenever N <= 512
    mp, tm = _row_tiling(m, max_tile=512)
    # v7x has 2 TensorCores: keep at least 2 blocks on a parallel grid axis.
    if (mp // tm) * (np_ // tn) == 1 and mp >= 16 and mp % 16 == 0:
        tm = mp // 2
    kp = _round_up(k, 128)

    def vmem_bytes(tk_, with_acc):
        bts = 2 * tm * tk_ * 2 + 2 * tk_ * tn * 2      # double-buffered bf16 A, B blocks
        bts += 2 * tm * tn * out_bytes                  # double-buffered output block
        bts += tm * tn * 4                              # f32 dot temporary
        if with_acc:
            bts += tm * tn * 4                          # f32 accumulator scratch
        if with_stats:
            bts += 2 * 2 * tn * 4
        if with_bias:
            bts += 2 * tn * 4
        return bts

    # Weight-stationary (single K step) whenever the full-K slab fits the VMEM budget.
    if vmem_bytes(kp, with_acc=False) <= _VMEM_BUDGET:
        tk, multi_k = kp, False
    else:
        multi_k = True
        tk = 128
        for t in (2048, 1024, 512, 256):
            if kp % t == 0 and vmem_bytes(t, with_acc=True) <= _VMEM_BUDGET:
                tk = t
                break

    # ---- operand padding (skipped when shapes already match) ---------------
    a_p = a.astype(jnp.bfloat16)
    if (mp, kp) != (m, k):
        a_p = jnp.pad(a_p, ((0, mp - m), (0, kp - k)))
    b_p = b.astype(jnp.bfloat16)
    if (kp, np_) != (k, n):
        b_p = jnp.pad(b_p, ((0, kp - k), (0, np_ - n)))
    operands = [a_p, b_p]

    # ---- specs --------------------------------------------------------------
    if multi_k:
        a_map = lambda i, j, kk: (i, kk)
        b_map = lambda i, j, kk: (kk, j)
        v_map = lambda i, j, kk: (0, j)
        o_map = lambda i, j, kk: (i, j)
        s_map = lambda i, j, kk: (i, 0, j)
        grid = (mp // tm, np_ // tn, kp // tk)
        dims = ("parallel", "parallel", "arbitrary")
        scratch = [pltpu.VMEM((tm, tn), jnp.float32)]
    else:
        a_map = lambda i, j: (i, 0)
        b_map = lambda i, j: (0, j)
        v_map = lambda i, j: (0, j)
        o_map = lambda i, j: (i, j)
        s_map = lambda i, j: (i, 0, j)
        grid = (mp // tm, np_ // tn)
        dims = ("parallel", "parallel")
        scratch = []

    in_specs = [pl.BlockSpec((tm, tk), a_map),
                pl.BlockSpec((tk, tn), b_map)]
    if with_bias:
        bias_p = bias.reshape(1, -1).astype(jnp.float32)
        if np_ != n:
            bias_p = jnp.pad(bias_p, ((0, 0), (0, np_ - n)))
        operands.append(bias_p)
        in_specs.append(pl.BlockSpec((1, tn), v_map))

    nib = mp // tm
    out_shape = [jax.ShapeDtypeStruct((mp, np_), out_dtype)]
    out_specs = [pl.BlockSpec((tm, tn), o_map)]
    if with_stats:
        out_shape.append(jax.ShapeDtypeStruct((nib, 2, np_), jnp.float32))
        out_specs.append(pl.BlockSpec((1, 2, tn), s_map))

    res = pl.pallas_call(
        functools.partial(_conv_matmul_kernel, apply_leaky=apply_leaky,
                          neg_slope=neg_slope, with_stats=with_stats,
                          with_bias=with_bias, multi_k=multi_k),
        out_shape=tuple(out_shape),
        grid_spec=pltpu.PrefetchScalarGridSpec(
            num_scalar_prefetch=0,
            grid=grid,
            in_specs=in_specs,
            out_specs=tuple(out_specs),
            scratch_shapes=scratch),
        compiler_params=pltpu.CompilerParams(
            dimension_semantics=dims,
            vmem_limit_bytes=_VMEM_LIMIT),
    )(*operands)

    y = res[0] if return_padded else res[0][:m, :n]
    if with_stats:
        stats = jnp.sum(res[1], axis=0)[:, :n]   # reduce tiny per-row-block partials
        return y, stats
    return y


def bn_leaky(x, scale, shift, *, out_dtype=jnp.bfloat16, neg_slope=0.2):
    """y = leaky_relu(x * scale + shift), per-column scale/shift (mem-bound).

    x may carry (row mult-of-8, col mult-of-128) padding straight from conv_matmul;
    output keeps the same padded shape.  scale/shift math is f32 even for bf16 x.
    """
    mp, cp = x.shape
    c = scale.shape[0]
    sp = scale.reshape(1, -1).astype(jnp.float32)
    hp = shift.reshape(1, -1).astype(jnp.float32)
    if cp != c:
        sp = jnp.pad(sp, ((0, 0), (0, cp - c)))
        hp = jnp.pad(hp, ((0, 0), (0, cp - c)))
    tm = _pick_divisor_tile(mp, (2048, 1024, 512, 256, 128, 64, 32, 16, 8))

    return pl.pallas_call(
        functools.partial(_bn_leaky_kernel, neg_slope=neg_slope),
        out_shape=jax.ShapeDtypeStruct((mp, cp), out_dtype),
        grid_spec=pltpu.PrefetchScalarGridSpec(
            num_scalar_prefetch=0,
            grid=(mp // tm,),
            in_specs=[
                pl.BlockSpec((tm, cp), lambda i: (i, 0)),
                pl.BlockSpec((1, cp), lambda i: (0, 0)),
                pl.BlockSpec((1, cp), lambda i: (0, 0)),
            ],
            out_specs=pl.BlockSpec((tm, cp), lambda i: (i, 0))),
        compiler_params=pltpu.CompilerParams(
            dimension_semantics=("parallel",),
            vmem_limit_bytes=_VMEM_LIMIT),
    )(x, sp, hp)


# ---------------------------------------------------------------------------
# Model: parameter construction + forward pass
# ---------------------------------------------------------------------------
def make_params(key, num_channels=3, hidden_channels=64, num_stages=3):
    """Deterministic synthetic parameters matching OriginalNLayerDiscriminator shapes."""
    layer_cfgs = []
    layer_cfgs.append(dict(cin=num_channels, cout=hidden_channels, stride=2,
                           bias=True, bn=False, leaky=True))
    nf_mult = 1
    for n in range(1, num_stages):
        nf_mult_prev, nf_mult = nf_mult, min(2 ** n, 8)
        layer_cfgs.append(dict(cin=hidden_channels * nf_mult_prev,
                               cout=hidden_channels * nf_mult, stride=2,
                               bias=False, bn=True, leaky=True))
    nf_mult_prev, nf_mult = nf_mult, min(2 ** num_stages, 8)
    layer_cfgs.append(dict(cin=hidden_channels * nf_mult_prev,
                           cout=hidden_channels * nf_mult, stride=1,
                           bias=False, bn=True, leaky=True))
    layer_cfgs.append(dict(cin=hidden_channels * nf_mult, cout=1, stride=1,
                           bias=True, bn=False, leaky=False))

    params = []
    for cfg in layer_cfgs:
        key, wk, bk = jax.random.split(key, 3)
        fan_in = cfg["cin"] * 4 * 4
        w = jax.random.normal(wk, (4, 4, cfg["cin"], cfg["cout"]), jnp.float32) / math.sqrt(fan_in)
        b = (0.01 * jax.random.normal(bk, (cfg["cout"],), jnp.float32)) if cfg["bias"] else None
        gamma = jnp.ones((cfg["cout"],), jnp.float32) if cfg["bn"] else None  # torch BN init
        beta = jnp.zeros((cfg["cout"],), jnp.float32) if cfg["bn"] else None
        params.append(dict(w=w, b=b, gamma=gamma, beta=beta,
                           stride=cfg["stride"], bn=cfg["bn"], leaky=cfg["leaky"]))
    return params


def discriminator_forward(x_nchw, params):
    """Pallas forward pass.  Input / output are NCHW like the PyTorch module."""
    # Activations held in bf16 between layers (numerically identical to casting them
    # to bf16 at the next layer's MXU input), halving inter-layer HBM traffic.
    x = jnp.transpose(x_nchw, (0, 2, 3, 1)).astype(jnp.bfloat16)  # -> NHWC
    n_layers = len(params)
    for li, p in enumerate(params):
        kh, kw, cin, cout = p["w"].shape
        patches, (n, oh, ow) = _im2col(x, kh, kw, p["stride"], 1)
        wmat = p["w"].reshape(kh * kw * cin, cout)
        is_last = li == n_layers - 1

        if p["bn"]:
            # Conv with per-column sum / sum_sq fused into the epilogue (from the f32
            # accumulator); pre-activation itself written in bf16.  No bias operand.
            y_pad, stats = conv_matmul(patches, wmat, None, apply_leaky=False,
                                       with_stats=True, out_dtype=jnp.bfloat16,
                                       return_padded=True)
            # BatchNorm2d training-mode semantics (batch stats, biased var, eps=1e-5),
            # as a freshly-constructed torch module computes in forward().
            m_rows = patches.shape[0]
            mean = stats[0] / m_rows
            var = jnp.maximum(stats[1] / m_rows - mean * mean, 0.0)
            invstd = lax.rsqrt(var + 1e-5)
            scale = p["gamma"] * invstd
            shift = p["beta"] - mean * scale
            y_pad = bn_leaky(y_pad, scale, shift, out_dtype=jnp.bfloat16, neg_slope=0.2)
            y = y_pad[:m_rows, :cout]   # single crop at the layer boundary
        else:
            out_dt = jnp.float32 if is_last else jnp.bfloat16
            y = conv_matmul(patches, wmat, p["b"], apply_leaky=p["leaky"],
                            with_stats=False, out_dtype=out_dt)
        x = y.reshape(n, oh, ow, cout)
    return jnp.transpose(x, (0, 3, 1, 2)).astype(jnp.float32)  # -> NCHW


def reference_forward(x_nchw, params):
    """Pure-JAX f32 reference (lax.conv) for correctness checking."""
    x = jnp.transpose(x_nchw, (0, 2, 3, 1)).astype(jnp.float32)
    for p in params:
        y = lax.conv_general_dilated(
            x, p["w"], (p["stride"], p["stride"]), [(1, 1), (1, 1)],
            dimension_numbers=("NHWC", "HWIO", "NHWC"))
        if p["b"] is not None:
            y = y + p["b"]
        if p["bn"]:
            mean = jnp.mean(y, axis=(0, 1, 2))
            var = jnp.mean((y - mean) ** 2, axis=(0, 1, 2))
            y = (y - mean) / jnp.sqrt(var + 1e-5) * p["gamma"] + p["beta"]
        if p["leaky"]:
            y = jnp.where(y >= 0, y, 0.2 * y)
        x = y
    return jnp.transpose(x, (0, 3, 1, 2))


# ---------------------------------------------------------------------------
if __name__ == "__main__":
    key = jax.random.PRNGKey(0)
    key, xkey, pkey = jax.random.split(key, 3)

    # Small shapes: batch=2, 3 input channels, 32x32 spatial (so all strided convs
    # keep positive spatial extent), hidden_channels=16, num_stages=3 (default).
    x = jax.random.normal(xkey, (2, 3, 32, 32), jnp.float32)
    params = make_params(pkey, num_channels=3, hidden_channels=16, num_stages=3)

    fwd = jax.jit(lambda inp: discriminator_forward(inp, params))
    out = jax.block_until_ready(fwd(x))

    ref = jax.block_until_ready(reference_forward(x, params))
    assert out.shape == ref.shape, (out.shape, ref.shape)
    # bf16 MXU inputs, bf16 inter-layer activations and a bf16 BN pre-activation
    # (stats / accumulation / BN math stay f32) -> slightly loosened tolerance.
    np.testing.assert_allclose(np.asarray(out), np.asarray(ref), rtol=3e-2, atol=3e-2)

    print("KERNEL_OK")
</pallas_src>

<mosaic_0001>
module attributes {stable_mosaic.version = 11 : i64} {
  func.func @_conv_matmul_kernel(%arg0: i32, %arg1: i32, %arg2: memref<256x128xbf16, #tpu.memory_space<vmem>>, %arg3: memref<128x128xbf16, #tpu.memory_space<vmem>>, %arg4: memref<1x128xf32, #tpu.memory_space<vmem>>, %arg5: memref<256x128xbf16, #tpu.memory_space<vmem>>) attributes {dimension_semantics = [#tpu.dimension_semantics<parallel>, #tpu.dimension_semantics<parallel>], iteration_bounds = array<i64: 2, 1>, scalar_prefetch = 0 : i64, scratch_operands = 0 : i64, tpu.core_type = #tpu.core_type<tc>, window_params = [{transform_indices = @transform_0, window_bounds = array<i64: 256, 128>}, {transform_indices = @transform_1, window_bounds = array<i64: 128, 128>}, {transform_indices = @transform_2, window_bounds = array<i64: 1, 128>}, {transform_indices = @transform_3, window_bounds = array<i64: 256, 128>}]} {
    %c0 = arith.constant 0 : index
    %c0_0 = arith.constant 0 : index
    %0 = vector.load %arg2[%c0, %c0_0] : memref<256x128xbf16, #tpu.memory_space<vmem>>, vector<256x128xbf16>
    %c0_1 = arith.constant 0 : index
    %c0_2 = arith.constant 0 : index
    %1 = vector.load %arg3[%c0_1, %c0_2] : memref<128x128xbf16, #tpu.memory_space<vmem>>, vector<128x128xbf16>
    %cst = arith.constant dense<0.000000e+00> : vector<256x128xf32>
    %2 = tpu.matmul %0, %1, %cst {dimension_numbers = #tpu.dot_dimension_numbers<[1], [0], [0], [1], [0, 0, 1, 1], [], []>} : vector<256x128xbf16>, vector<128x128xbf16>, vector<256x128xf32> -> vector<256x128xf32>
    %c0_3 = arith.constant 0 : index
    %c0_4 = arith.constant 0 : index
    %3 = vector.load %arg4[%c0_3, %c0_4] : memref<1x128xf32, #tpu.memory_space<vmem>>, vector<1x128xf32>
    %4 = vector.broadcast %3 : vector<1x128xf32> to vector<256x128xf32>
    %5 = arith.addf %2, %4 : vector<256x128xf32>
    %cst_5 = arith.constant 0.000000e+00 : f32
    %6 = vector.broadcast %cst_5 : f32 to vector<256x128xf32>
    %7 = arith.cmpf oge, %5, %6 : vector<256x128xf32>
    %cst_6 = arith.constant 2.000000e-01 : f32
    %8 = vector.broadcast %cst_6 : f32 to vector<256x128xf32>
    %9 = arith.mulf %8, %5 : vector<256x128xf32>
    %10 = arith.select %7, %5, %9 : vector<256x128xi1>, vector<256x128xf32>
    %11 = arith.truncf %10 : vector<256x128xf32> to vector<256x128xbf16>
    %c0_7 = arith.constant 0 : index
    %c0_8 = arith.constant 0 : index
    %12 = vector.load %arg5[%c0_7, %c0_8] : memref<256x128xbf16, #tpu.memory_space<vmem>>, vector<256x128xbf16>
    tpu.vector_store %arg5[%c0_7, %c0_8], %11 {strides = array<i32>} : memref<256x128xbf16, #tpu.memory_space<vmem>>, vector<256x128xbf16>,
    return
  }
  func.func @transform_0(%arg0: i32, %arg1: i32) -> (i32, i32) {
    %c0_i32 = arith.constant 0 : i32
    %c0_i32_0 = arith.constant 0 : i32
    return %arg0, %c0_i32 : i32, i32
  }
  func.func @transform_1(%arg0: i32, %arg1: i32) -> (i32, i32) {
    %c0_i32 = arith.constant 0 : i32
    %c0_i32_0 = arith.constant 0 : i32
    return %c0_i32, %arg1 : i32, i32
  }
  func.func @transform_2(%arg0: i32, %arg1: i32) -> (i32, i32) {
    %c0_i32 = arith.constant 0 : i32
    %c0_i32_0 = arith.constant 0 : i32
    return %c0_i32, %arg1 : i32, i32
  }
  func.func @transform_3(%arg0: i32, %arg1: i32) -> (i32, i32) {
    %c0_i32 = arith.constant 0 : i32
    return %arg0, %arg1 : i32, i32
  }
}

module attributes {stable_mosaic.version = 11 : i64} {
  func.func @_conv_matmul_kernel(%arg0: i32, %arg1: i32, %arg2: memref<64x256xbf16, #tpu.memory_space<vmem>>, %arg3: memref<256x128xbf16, #tpu.memory_space<vmem>>, %arg4: memref<64x128xbf16, #tpu.memory_space<vmem>>, %arg5: memref<1x2x128xf32, #tpu.memory_space<vmem>>) attributes {dimension_semantics = [#tpu.dimension_semantics<parallel>, #tpu.dimension_semantics<parallel>], iteration_bounds = array<i64: 2, 1>, scalar_prefetch = 0 : i64, scratch_operands = 0 : i64, tpu.core_type = #tpu.core_type<tc>, window_params = [{transform_indices = @transform_0, window_bounds = array<i64: 64, 256>}, {transform_indices = @transform_1, window_bounds = array<i64: 256, 128>}, {transform_indices = @transform_2, window_bounds = array<i64: 64, 128>}, {transform_indices = @transform_3, window_bounds = array<i64: 1, 2, 128>}]} {
    %c0 = arith.constant 0 : index
    %c0_0 = arith.constant 0 : index
    %0 = vector.load %arg2[%c0, %c0_0] : memref<64x256xbf16, #tpu.memory_space<vmem>>, vector<64x256xbf16>
    %c0_1 = arith.constant 0 : index
    %c0_2 = arith.constant 0 : index
    %1 = vector.load %arg3[%c0_1, %c0_2] : memref<256x128xbf16, #tpu.memory_space<vmem>>, vector<256x128xbf16>
    %cst = arith.constant dense<0.000000e+00> : vector<64x128xf32>
    %2 = tpu.matmul %0, %1, %cst {dimension_numbers = #tpu.dot_dimension_numbers<[1], [0], [0], [1], [0, 0, 1, 1], [], []>} : vector<64x256xbf16>, vector<256x128xbf16>, vector<64x128xf32> -> vector<64x128xf32>
    %cst_3 = arith.constant dense<0.000000e+00> : vector<128xf32>
    %3 = vector.multi_reduction <add>, %2, %cst_3 [0] : vector<64x128xf32> to vector<128xf32>
    %4 = vector.shape_cast %3 : vector<128xf32> to vector<1x128xf32>
    %5 = arith.mulf %2, %2 : vector<64x128xf32>
    %cst_4 = arith.constant dense<0.000000e+00> : vector<128xf32>
    %6 = vector.multi_reduction <add>, %5, %cst_4 [0] : vector<64x128xf32> to vector<128xf32>
    %7 = vector.shape_cast %6 : vector<128xf32> to vector<1x128xf32>
    %8 = tpu.concatenate %4, %7 in 0 : vector<1x128xf32>, vector<1x128xf32> -> vector<2x128xf32>
    %9 = vector.shape_cast %8 : vector<2x128xf32> to vector<1x2x128xf32>
    %c0_5 = arith.constant 0 : index
    %c0_6 = arith.constant 0 : index
    %c0_7 = arith.constant 0 : index
    %10 = vector.load %arg5[%c0_5, %c0_6, %c0_7] : memref<1x2x128xf32, #tpu.memory_space<vmem>>, vector<1x2x128xf32>
    tpu.vector_store %arg5[%c0_5, %c0_6, %c0_7], %9 {strides = array<i32>} : memref<1x2x128xf32, #tpu.memory_space<vmem>>, vector<1x2x128xf32>,
    %11 = arith.truncf %2 : vector<64x128xf32> to vector<64x128xbf16>
    %c0_8 = arith.constant 0 : index
    %c0_9 = arith.constant 0 : index
    %12 = vector.load %arg4[%c0_8, %c0_9] : memref<64x128xbf16, #tpu.memory_space<vmem>>, vector<64x128xbf16>
    tpu.vector_store %arg4[%c0_8, %c0_9], %11 {strides = array<i32>} : memref<64x128xbf16, #tpu.memory_space<vmem>>, vector<64x128xbf16>,
    return
  }
  func.func @transform_0(%arg0: i32, %arg1: i32) -> (i32, i32) {
    %c0_i32 = arith.constant 0 : i32
    %c0_i32_0 = arith.constant 0 : i32
    return %arg0, %c0_i32 : i32, i32
  }
  func.func @transform_1(%arg0: i32, %arg1: i32) -> (i32, i32) {
    %c0_i32 = arith.constant 0 : i32
    %c0_i32_0 = arith.constant 0 : i32
    return %c0_i32, %arg1 : i32, i32
  }
  func.func @transform_2(%arg0: i32, %arg1: i32) -> (i32, i32) {
    %c0_i32 = arith.constant 0 : i32
    return %arg0, %arg1 : i32, i32
  }
  func.func @transform_3(%arg0: i32, %arg1: i32) -> (i32, i32, i32) {
    %c0_i32 = arith.constant 0 : i32
    %c0_i32_0 = arith.constant 0 : i32
    return %arg0, %c0_i32, %arg1 : i32, i32, i32
  }
}

module attributes {stable_mosaic.version = 11 : i64} {
  func.func @_bn_leaky_kernel(%arg0: i32, %arg1: memref<128x128xbf16, #tpu.memory_space<vmem>>, %arg2: memref<1x128xf32, #tpu.memory_space<vmem>>, %arg3: memref<1x128xf32, #tpu.memory_space<vmem>>, %arg4: memref<128x128xbf16, #tpu.memory_space<vmem>>) attributes {dimension_semantics = [#tpu.dimension_semantics<parallel>], iteration_bounds = array<i64: 1>, scalar_prefetch = 0 : i64, scratch_operands = 0 : i64, tpu.core_type = #tpu.core_type<tc>, window_params = [{transform_indices = @transform_0, window_bounds = array<i64: 128, 128>}, {pipeline_mode = #tpu.pipeline_mode<synchronous>, transform_indices = @transform_1, window_bounds = array<i64: 1, 128>}, {pipeline_mode = #tpu.pipeline_mode<synchronous>, transform_indices = @transform_2, window_bounds = array<i64: 1, 128>}, {transform_indices = @transform_3, window_bounds = array<i64: 128, 128>}]} {
    %c0 = arith.constant 0 : index
    %c0_0 = arith.constant 0 : index
    %0 = vector.load %arg1[%c0, %c0_0] : memref<128x128xbf16, #tpu.memory_space<vmem>>, vector<128x128xbf16>
    %1 = arith.extf %0 : vector<128x128xbf16> to vector<128x128xf32>
    %c0_1 = arith.constant 0 : index
    %c0_2 = arith.constant 0 : index
    %2 = vector.load %arg2[%c0_1, %c0_2] : memref<1x128xf32, #tpu.memory_space<vmem>>, vector<1x128xf32>
    %3 = vector.broadcast %2 : vector<1x128xf32> to vector<128x128xf32>
    %4 = arith.mulf %1, %3 : vector<128x128xf32>
    %c0_3 = arith.constant 0 : index
    %c0_4 = arith.constant 0 : index
    %5 = vector.load %arg3[%c0_3, %c0_4] : memref<1x128xf32, #tpu.memory_space<vmem>>, vector<1x128xf32>
    %6 = vector.broadcast %5 : vector<1x128xf32> to vector<128x128xf32>
    %7 = arith.addf %4, %6 : vector<128x128xf32>
    %cst = arith.constant 0.000000e+00 : f32
    %8 = vector.broadcast %cst : f32 to vector<128x128xf32>
    %9 = arith.cmpf oge, %7, %8 : vector<128x128xf32>
    %cst_5 = arith.constant 2.000000e-01 : f32
    %10 = vector.broadcast %cst_5 : f32 to vector<128x128xf32>
    %11 = arith.mulf %10, %7 : vector<128x128xf32>
    %12 = arith.select %9, %7, %11 : vector<128x128xi1>, vector<128x128xf32>
    %13 = arith.truncf %12 : vector<128x128xf32> to vector<128x128xbf16>
    %c0_6 = arith.constant 0 : index
    %c0_7 = arith.constant 0 : index
    %14 = vector.load %arg4[%c0_6, %c0_7] : memref<128x128xbf16, #tpu.memory_space<vmem>>, vector<128x128xbf16>
    tpu.vector_store %arg4[%c0_6, %c0_7], %13 {strides = array<i32>} : memref<128x128xbf16, #tpu.memory_space<vmem>>, vector<128x128xbf16>,
    return
  }
  func.func @transform_0(%arg0: i32) -> (i32, i32) {
    %c0_i32 = arith.constant 0 : i32
    %c0_i32_0 = arith.constant 0 : i32
    return %arg0, %c0_i32 : i32, i32
  }
  func.func @transform_1(%arg0: i32) -> (i32, i32) {
    %c0_i32 = arith.constant 0 : i32
    %c0_i32_0 = arith.constant 0 : i32
    %c0_i32_1 = arith.constant 0 : i32
    return %c0_i32, %c0_i32_0 : i32, i32
  }
  func.func @transform_2(%arg0: i32) -> (i32, i32) {
    %c0_i32 = arith.constant 0 : i32
    %c0_i32_0 = arith.constant 0 : i32
    %c0_i32_1 = arith.constant 0 : i32
    return %c0_i32, %c0_i32_0 : i32, i32
  }
  func.func @transform_3(%arg0: i32) -> (i32, i32) {
    %c0_i32 = arith.constant 0 : i32
    %c0_i32_0 = arith.constant 0 : i32
    return %arg0, %c0_i32 : i32, i32
  }
}

module attributes {stable_mosaic.version = 11 : i64} {
  func.func @_conv_matmul_kernel(%arg0: i32, %arg1: i32, %arg2: memref<16x512xbf16, #tpu.memory_space<vmem>>, %arg3: memref<512x128xbf16, #tpu.memory_space<vmem>>, %arg4: memref<16x128xbf16, #tpu.memory_space<vmem>>, %arg5: memref<1x2x128xf32, #tpu.memory_space<vmem>>) attributes {dimension_semantics = [#tpu.dimension_semantics<parallel>, #tpu.dimension_semantics<parallel>], iteration_bounds = array<i64: 2, 1>, scalar_prefetch = 0 : i64, scratch_operands = 0 : i64, tpu.core_type = #tpu.core_type<tc>, window_params = [{transform_indices = @transform_0, window_bounds = array<i64: 16, 512>}, {transform_indices = @transform_1, window_bounds = array<i64: 512, 128>}, {transform_indices = @transform_2, window_bounds = array<i64: 16, 128>}, {transform_indices = @transform_3, window_bounds = array<i64: 1, 2, 128>}]} {
    %c0 = arith.constant 0 : index
    %c0_0 = arith.constant 0 : index
    %0 = vector.load %arg2[%c0, %c0_0] : memref<16x512xbf16, #tpu.memory_space<vmem>>, vector<16x512xbf16>
    %c0_1 = arith.constant 0 : index
    %c0_2 = arith.constant 0 : index
    %1 = vector.load %arg3[%c0_1, %c0_2] : memref<512x128xbf16, #tpu.memory_space<vmem>>, vector<512x128xbf16>
    %cst = arith.constant dense<0.000000e+00> : vector<16x128xf32>
    %2 = tpu.matmul %0, %1, %cst {dimension_numbers = #tpu.dot_dimension_numbers<[1], [0], [0], [1], [0, 0, 1, 1], [], []>} : vector<16x512xbf16>, vector<512x128xbf16>, vector<16x128xf32> -> vector<16x128xf32>
    %cst_3 = arith.constant dense<0.000000e+00> : vector<128xf32>
    %3 = vector.multi_reduction <add>, %2, %cst_3 [0] : vector<16x128xf32> to vector<128xf32>
    %4 = vector.shape_cast %3 : vector<128xf32> to vector<1x128xf32>
    %5 = arith.mulf %2, %2 : vector<16x128xf32>
    %cst_4 = arith.constant dense<0.000000e+00> : vector<128xf32>
    %6 = vector.multi_reduction <add>, %5, %cst_4 [0] : vector<16x128xf32> to vector<128xf32>
    %7 = vector.shape_cast %6 : vector<128xf32> to vector<1x128xf32>
    %8 = tpu.concatenate %4, %7 in 0 : vector<1x128xf32>, vector<1x128xf32> -> vector<2x128xf32>
    %9 = vector.shape_cast %8 : vector<2x128xf32> to vector<1x2x128xf32>
    %c0_5 = arith.constant 0 : index
    %c0_6 = arith.constant 0 : index
    %c0_7 = arith.constant 0 : index
    %10 = vector.load %arg5[%c0_5, %c0_6, %c0_7] : memref<1x2x128xf32, #tpu.memory_space<vmem>>, vector<1x2x128xf32>
    tpu.vector_store %arg5[%c0_5, %c0_6, %c0_7], %9 {strides = array<i32>} : memref<1x2x128xf32, #tpu.memory_space<vmem>>, vector<1x2x128xf32>,
    %11 = arith.truncf %2 : vector<16x128xf32> to vector<16x128xbf16>
    %c0_8 = arith.constant 0 : index
    %c0_9 = arith.constant 0 : index
    %12 = vector.load %arg4[%c0_8, %c0_9] : memref<16x128xbf16, #tpu.memory_space<vmem>>, vector<16x128xbf16>
    tpu.vector_store %arg4[%c0_8, %c0_9], %11 {strides = array<i32>} : memref<16x128xbf16, #tpu.memory_space<vmem>>, vector<16x128xbf16>,
    return
  }
  func.func @transform_0(%arg0: i32, %arg1: i32) -> (i32, i32) {
    %c0_i32 = arith.constant 0 : i32
    %c0_i32_0 = arith.constant 0 : i32
    return %arg0, %c0_i32 : i32, i32
  }
  func.func @transform_1(%arg0: i32, %arg1: i32) -> (i32, i32) {
    %c0_i32 = arith.constant 0 : i32
    %c0_i32_0 = arith.constant 0 : i32
    return %c0_i32, %arg1 : i32, i32
  }
  func.func @transform_2(%arg0: i32, %arg1: i32) -> (i32, i32) {
    %c0_i32 = arith.constant 0 : i32
    return %arg0, %arg1 : i32, i32
  }
  func.func @transform_3(%arg0: i32, %arg1: i32) -> (i32, i32, i32) {
    %c0_i32 = arith.constant 0 : i32
    %c0_i32_0 = arith.constant 0 : i32
    return %arg0, %c0_i32, %arg1 : i32, i32, i32
  }
}

module attributes {stable_mosaic.version = 11 : i64} {
  func.func @_bn_leaky_kernel(%arg0: i32, %arg1: memref<32x128xbf16, #tpu.memory_space<vmem>>, %arg2: memref<1x128xf32, #tpu.memory_space<vmem>>, %arg3: memref<1x128xf32, #tpu.memory_space<vmem>>, %arg4: memref<32x128xbf16, #tpu.memory_space<vmem>>) attributes {dimension_semantics = [#tpu.dimension_semantics<parallel>], iteration_bounds = array<i64: 1>, scalar_prefetch = 0 : i64, scratch_operands = 0 : i64, tpu.core_type = #tpu.core_type<tc>, window_params = [{transform_indices = @transform_0, window_bounds = array<i64: 32, 128>}, {pipeline_mode = #tpu.pipeline_mode<synchronous>, transform_indices = @transform_1, window_bounds = array<i64: 1, 128>}, {pipeline_mode = #tpu.pipeline_mode<synchronous>, transform_indices = @transform_2, window_bounds = array<i64: 1, 128>}, {transform_indices = @transform_3, window_bounds = array<i64: 32, 128>}]} {
    %c0 = arith.constant 0 : index
    %c0_0 = arith.constant 0 : index
    %0 = vector.load %arg1[%c0, %c0_0] : memref<32x128xbf16, #tpu.memory_space<vmem>>, vector<32x128xbf16>
    %1 = arith.extf %0 : vector<32x128xbf16> to vector<32x128xf32>
    %c0_1 = arith.constant 0 : index
    %c0_2 = arith.constant 0 : index
    %2 = vector.load %arg2[%c0_1, %c0_2] : memref<1x128xf32, #tpu.memory_space<vmem>>, vector<1x128xf32>
    %3 = vector.broadcast %2 : vector<1x128xf32> to vector<32x128xf32>
    %4 = arith.mulf %1, %3 : vector<32x128xf32>
    %c0_3 = arith.constant 0 : index
    %c0_4 = arith.constant 0 : index
    %5 = vector.load %arg3[%c0_3, %c0_4] : memref<1x128xf32, #tpu.memory_space<vmem>>, vector<1x128xf32>
    %6 = vector.broadcast %5 : vector<1x128xf32> to vector<32x128xf32>
    %7 = arith.addf %4, %6 : vector<32x128xf32>
    %cst = arith.constant 0.000000e+00 : f32
    %8 = vector.broadcast %cst : f32 to vector<32x128xf32>
    %9 = arith.cmpf oge, %7, %8 : vector<32x128xf32>
    %cst_5 = arith.constant 2.000000e-01 : f32
    %10 = vector.broadcast %cst_5 : f32 to vector<32x128xf32>
    %11 = arith.mulf %10, %7 : vector<32x128xf32>
    %12 = arith.select %9, %7, %11 : vector<32x128xi1>, vector<32x128xf32>
    %13 = arith.truncf %12 : vector<32x128xf32> to vector<32x128xbf16>
    %c0_6 = arith.constant 0 : index
    %c0_7 = arith.constant 0 : index
    %14 = vector.load %arg4[%c0_6, %c0_7] : memref<32x128xbf16, #tpu.memory_space<vmem>>, vector<32x128xbf16>
    tpu.vector_store %arg4[%c0_6, %c0_7], %13 {strides = array<i32>} : memref<32x128xbf16, #tpu.memory_space<vmem>>, vector<32x128xbf16>,
    return
  }
  func.func @transform_0(%arg0: i32) -> (i32, i32) {
    %c0_i32 = arith.constant 0 : i32
    %c0_i32_0 = arith.constant 0 : i32
    return %arg0, %c0_i32 : i32, i32
  }
  func.func @transform_1(%arg0: i32) -> (i32, i32) {
    %c0_i32 = arith.constant 0 : i32
    %c0_i32_0 = arith.constant 0 : i32
    %c0_i32_1 = arith.constant 0 : i32
    return %c0_i32, %c0_i32_0 : i32, i32
  }
  func.func @transform_2(%arg0: i32) -> (i32, i32) {
    %c0_i32 = arith.constant 0 : i32
    %c0_i32_0 = arith.constant 0 : i32
    %c0_i32_1 = arith.constant 0 : i32
    return %c0_i32, %c0_i32_0 : i32, i32
  }
  func.func @transform_3(%arg0: i32) -> (i32, i32) {
    %c0_i32 = arith.constant 0 : i32
    %c0_i32_0 = arith.constant 0 : i32
    return %arg0, %c0_i32 : i32, i32
  }
}

module attributes {stable_mosaic.version = 11 : i64} {
  func.func @_conv_matmul_kernel(%arg0: i32, %arg1: i32, %arg2: memref<24x1024xbf16, #tpu.memory_space<vmem>>, %arg3: memref<1024x128xbf16, #tpu.memory_space<vmem>>, %arg4: memref<24x128xbf16, #tpu.memory_space<vmem>>, %arg5: memref<1x2x128xf32, #tpu.memory_space<vmem>>) attributes {dimension_semantics = [#tpu.dimension_semantics<parallel>, #tpu.dimension_semantics<parallel>], iteration_bounds = array<i64: 1, 1>, scalar_prefetch = 0 : i64, scratch_operands = 0 : i64, tpu.core_type = #tpu.core_type<tc>, window_params = [{transform_indices = @transform_0, window_bounds = array<i64: 24, 1024>}, {transform_indices = @transform_1, window_bounds = array<i64: 1024, 128>}, {transform_indices = @transform_2, window_bounds = array<i64: 24, 128>}, {transform_indices = @transform_3, window_bounds = array<i64: 1, 2, 128>}]} {
    %c0 = arith.constant 0 : index
    %c0_0 = arith.constant 0 : index
    %0 = vector.load %arg2[%c0, %c0_0] : memref<24x1024xbf16, #tpu.memory_space<vmem>>, vector<24x1024xbf16>
    %c0_1 = arith.constant 0 : index
    %c0_2 = arith.constant 0 : index
    %1 = vector.load %arg3[%c0_1, %c0_2] : memref<1024x128xbf16, #tpu.memory_space<vmem>>, vector<1024x128xbf16>
    %cst = arith.constant dense<0.000000e+00> : vector<24x128xf32>
    %2 = tpu.matmul %0, %1, %cst {dimension_numbers = #tpu.dot_dimension_numbers<[1], [0], [0], [1], [0, 0, 1, 1], [], []>} : vector<24x1024xbf16>, vector<1024x128xbf16>, vector<24x128xf32> -> vector<24x128xf32>
    %cst_3 = arith.constant dense<0.000000e+00> : vector<128xf32>
    %3 = vector.multi_reduction <add>, %2, %cst_3 [0] : vector<24x128xf32> to vector<128xf32>
    %4 = vector.shape_cast %3 : vector<128xf32> to vector<1x128xf32>
    %5 = arith.mulf %2, %2 : vector<24x128xf32>
    %cst_4 = arith.constant dense<0.000000e+00> : vector<128xf32>
    %6 = vector.multi_reduction <add>, %5, %cst_4 [0] : vector<24x128xf32> to vector<128xf32>
    %7 = vector.shape_cast %6 : vector<128xf32> to vector<1x128xf32>
    %8 = tpu.concatenate %4, %7 in 0 : vector<1x128xf32>, vector<1x128xf32> -> vector<2x128xf32>
    %9 = vector.shape_cast %8 : vector<2x128xf32> to vector<1x2x128xf32>
    %c0_5 = arith.constant 0 : index
    %c0_6 = arith.constant 0 : index
    %c0_7 = arith.constant 0 : index
    %10 = vector.load %arg5[%c0_5, %c0_6, %c0_7] : memref<1x2x128xf32, #tpu.memory_space<vmem>>, vector<1x2x128xf32>
    tpu.vector_store %arg5[%c0_5, %c0_6, %c0_7], %9 {strides = array<i32>} : memref<1x2x128xf32, #tpu.memory_space<vmem>>, vector<1x2x128xf32>,
    %11 = arith.truncf %2 : vector<24x128xf32> to vector<24x128xbf16>
    %c0_8 = arith.constant 0 : index
    %c0_9 = arith.constant 0 : index
    %12 = vector.load %arg4[%c0_8, %c0_9] : memref<24x128xbf16, #tpu.memory_space<vmem>>, vector<24x128xbf16>
    tpu.vector_store %arg4[%c0_8, %c0_9], %11 {strides = array<i32>} : memref<24x128xbf16, #tpu.memory_space<vmem>>, vector<24x128xbf16>,
    return
  }
  func.func @transform_0(%arg0: i32, %arg1: i32) -> (i32, i32) {
    %c0_i32 = arith.constant 0 : i32
    %c0_i32_0 = arith.constant 0 : i32
    return %arg0, %c0_i32 : i32, i32
  }
  func.func @transform_1(%arg0: i32, %arg1: i32) -> (i32, i32) {
    %c0_i32 = arith.constant 0 : i32
    %c0_i32_0 = arith.constant 0 : i32
    return %c0_i32, %arg1 : i32, i32
  }
  func.func @transform_2(%arg0: i32, %arg1: i32) -> (i32, i32) {
    %c0_i32 = arith.constant 0 : i32
    return %arg0, %arg1 : i32, i32
  }
  func.func @transform_3(%arg0: i32, %arg1: i32) -> (i32, i32, i32) {
    %c0_i32 = arith.constant 0 : i32
    %c0_i32_0 = arith.constant 0 : i32
    return %arg0, %c0_i32, %arg1 : i32, i32, i32
  }
}

module attributes {stable_mosaic.version = 11 : i64} {
  func.func @_bn_leaky_kernel(%arg0: i32, %arg1: memref<8x128xbf16, #tpu.memory_space<vmem>>, %arg2: memref<1x128xf32, #tpu.memory_space<vmem>>, %arg3: memref<1x128xf32, #tpu.memory_space<vmem>>, %arg4: memref<8x128xbf16, #tpu.memory_space<vmem>>) attributes {dimension_semantics = [#tpu.dimension_semantics<parallel>], iteration_bounds = array<i64: 3>, scalar_prefetch = 0 : i64, scratch_operands = 0 : i64, tpu.core_type = #tpu.core_type<tc>, window_params = [{transform_indices = @transform_0, window_bounds = array<i64: 8, 128>}, {pipeline_mode = #tpu.pipeline_mode<synchronous>, transform_indices = @transform_1, window_bounds = array<i64: 1, 128>}, {pipeline_mode = #tpu.pipeline_mode<synchronous>, transform_indices = @transform_2, window_bounds = array<i64: 1, 128>}, {transform_indices = @transform_3, window_bounds = array<i64: 8, 128>}]} {
    %c0 = arith.constant 0 : index
    %c0_0 = arith.constant 0 : index
    %0 = vector.load %arg1[%c0, %c0_0] : memref<8x128xbf16, #tpu.memory_space<vmem>>, vector<8x128xbf16>
    %1 = arith.extf %0 : vector<8x128xbf16> to vector<8x128xf32>
    %c0_1 = arith.constant 0 : index
    %c0_2 = arith.constant 0 : index
    %2 = vector.load %arg2[%c0_1, %c0_2] : memref<1x128xf32, #tpu.memory_space<vmem>>, vector<1x128xf32>
    %3 = vector.broadcast %2 : vector<1x128xf32> to vector<8x128xf32>
    %4 = arith.mulf %1, %3 : vector<8x128xf32>
    %c0_3 = arith.constant 0 : index
    %c0_4 = arith.constant 0 : index
    %5 = vector.load %arg3[%c0_3, %c0_4] : memref<1x128xf32, #tpu.memory_space<vmem>>, vector<1x128xf32>
    %6 = vector.broadcast %5 : vector<1x128xf32> to vector<8x128xf32>
    %7 = arith.addf %4, %6 : vector<8x128xf32>
    %cst = arith.constant 0.000000e+00 : f32
    %8 = vector.broadcast %cst : f32 to vector<8x128xf32>
    %9 = arith.cmpf oge, %7, %8 : vector<8x128xf32>
    %cst_5 = arith.constant 2.000000e-01 : f32
    %10 = vector.broadcast %cst_5 : f32 to vector<8x128xf32>
    %11 = arith.mulf %10, %7 : vector<8x128xf32>
    %12 = arith.select %9, %7, %11 : vector<8x128xi1>, vector<8x128xf32>
    %13 = arith.truncf %12 : vector<8x128xf32> to vector<8x128xbf16>
    %c0_6 = arith.constant 0 : index
    %c0_7 = arith.constant 0 : index
    %14 = vector.load %arg4[%c0_6, %c0_7] : memref<8x128xbf16, #tpu.memory_space<vmem>>, vector<8x128xbf16>
    tpu.vector_store %arg4[%c0_6, %c0_7], %13 {strides = array<i32>} : memref<8x128xbf16, #tpu.memory_space<vmem>>, vector<8x128xbf16>,
    return
  }
  func.func @transform_0(%arg0: i32) -> (i32, i32) {
    %c0_i32 = arith.constant 0 : i32
    %c0_i32_0 = arith.constant 0 : i32
    return %arg0, %c0_i32 : i32, i32
  }
  func.func @transform_1(%arg0: i32) -> (i32, i32) {
    %c0_i32 = arith.constant 0 : i32
    %c0_i32_0 = arith.constant 0 : i32
    %c0_i32_1 = arith.constant 0 : i32
    return %c0_i32, %c0_i32_0 : i32, i32
  }
  func.func @transform_2(%arg0: i32) -> (i32, i32) {
    %c0_i32 = arith.constant 0 : i32
    %c0_i32_0 = arith.constant 0 : i32
    %c0_i32_1 = arith.constant 0 : i32
    return %c0_i32, %c0_i32_0 : i32, i32
  }
  func.func @transform_3(%arg0: i32) -> (i32, i32) {
    %c0_i32 = arith.constant 0 : i32
    %c0_i32_0 = arith.constant 0 : i32
    return %arg0, %c0_i32 : i32, i32
  }
}

module attributes {stable_mosaic.version = 11 : i64} {
  func.func @_conv_matmul_kernel(%arg0: i32, %arg1: i32, %arg2: memref<8x2048xbf16, #tpu.memory_space<vmem>>, %arg3: memref<2048x128xbf16, #tpu.memory_space<vmem>>, %arg4: memref<1x128xf32, #tpu.memory_space<vmem>>, %arg5: memref<8x128xf32, #tpu.memory_space<vmem>>) attributes {dimension_semantics = [#tpu.dimension_semantics<parallel>, #tpu.dimension_semantics<parallel>], iteration_bounds = array<i64: 1, 1>, scalar_prefetch = 0 : i64, scratch_operands = 0 : i64, tpu.core_type = #tpu.core_type<tc>, window_params = [{transform_indices = @transform_0, window_bounds = array<i64: 8, 2048>}, {transform_indices = @transform_1, window_bounds = array<i64: 2048, 128>}, {transform_indices = @transform_2, window_bounds = array<i64: 1, 128>}, {transform_indices = @transform_3, window_bounds = array<i64: 8, 128>}]} {
    %c0 = arith.constant 0 : index
    %c0_0 = arith.constant 0 : index
    %0 = vector.load %arg2[%c0, %c0_0] : memref<8x2048xbf16, #tpu.memory_space<vmem>>, vector<8x2048xbf16>
    %c0_1 = arith.constant 0 : index
    %c0_2 = arith.constant 0 : index
    %1 = vector.load %arg3[%c0_1, %c0_2] : memref<2048x128xbf16, #tpu.memory_space<vmem>>, vector<2048x128xbf16>
    %cst = arith.constant dense<0.000000e+00> : vector<8x128xf32>
    %2 = tpu.matmul %0, %1, %cst {dimension_numbers = #tpu.dot_dimension_numbers<[1], [0], [0], [1], [0, 0, 1, 1], [], []>} : vector<8x2048xbf16>, vector<2048x128xbf16>, vector<8x128xf32> -> vector<8x128xf32>
    %c0_3 = arith.constant 0 : index
    %c0_4 = arith.constant 0 : index
    %3 = vector.load %arg4[%c0_3, %c0_4] : memref<1x128xf32, #tpu.memory_space<vmem>>, vector<1x128xf32>
    %4 = vector.broadcast %3 : vector<1x128xf32> to vector<8x128xf32>
    %5 = arith.addf %2, %4 : vector<8x128xf32>
    %c0_5 = arith.constant 0 : index
    %c0_6 = arith.constant 0 : index
    %6 = vector.load %arg5[%c0_5, %c0_6] : memref<8x128xf32, #tpu.memory_space<vmem>>, vector<8x128xf32>
    tpu.vector_store %arg5[%c0_5, %c0_6], %5 {strides = array<i32>} : memref<8x128xf32, #tpu.memory_space<vmem>>, vector<8x128xf32>,
    return
  }
  func.func @transform_0(%arg0: i32, %arg1: i32) -> (i32, i32) {
    %c0_i32 = arith.constant 0 : i32
    %c0_i32_0 = arith.constant 0 : i32
    return %arg0, %c0_i32 : i32, i32
  }
  func.func @transform_1(%arg0: i32, %arg1: i32) -> (i32, i32) {
    %c0_i32 = arith.constant 0 : i32
    %c0_i32_0 = arith.constant 0 : i32
    return %c0_i32, %arg1 : i32, i32
  }
  func.func @transform_2(%arg0: i32, %arg1: i32) -> (i32, i32) {
    %c0_i32 = arith.constant 0 : i32
    %c0_i32_0 = arith.constant 0 : i32
    return %c0_i32, %arg1 : i32, i32
  }
  func.func @transform_3(%arg0: i32, %arg1: i32) -> (i32, i32) {
    %c0_i32 = arith.constant 0 : i32
    return %arg0, %arg1 : i32, i32
  }
}

</mosaic_0001>

<bundles_post_ra>
// kernel: _lambda_.8
= control target key start
LH: loop header
LB: loop body
LE: loop exit
PB: predicated region body
PF: predicated region fallthrough
CT: control target
= control target key end

     0   :  { %s1093_s12 = smov 0   ;;  %s1095_s13 = smov 0   ;;  %s1233_s0 = inlined_call_operand.vmem [shape: bf16[512,128], index: 0, kind: input, shape index: {}]   ;;  %s1234_s1 = inlined_call_operand.vmem [shape: bf16[128,128], index: 1, kind: input, shape index: {}]   ;;  %s1235_s2 = inlined_call_operand.vmem [shape: f32[1,128], index: 2, kind: input, shape index: {}]   ;;  %s1236_s3 = inlined_call_operand.vmem [shape: bf16[512,128], index: 3, kind: output, shape index: {}]  }
   0x1   :  { %s1097_s14 = smov 0  }
   0x2 LB: > { %s25_s15 = sadd.s32 1, %s1067_s13  ;;  %p778_p0 = scmp.ge.s32.totalorder %s1071_s14, 1  ;;  %s1071_s14 = sphi %s1097_s14, %s13_s14   ;;  %s1067_s13 = sphi %s1095_s13, %s1238_s13   ;;  %s1063_s12 = sphi %s1093_s12, %s1237_s12  }
   0x3   : > { %p27_p1 = scmp.ge.s32.totalorder %s25_s15, 2  ;;  %p169_p2 = scmp.lt.s32.totalorder %s1071_s14, 3 }
   0x5   : > { %s1240_s15 = smov (%p27_p1, %s25_s15), 0  ;;  %p170_p3 = pnand %p778_p0, %p169_p2 }
   0x6   : > { %s779_s24 = sshll.u32 (!%p170_p3), %s1063_s12, 5 }
   0x7   : > { %173 = sbr.rel (%p170_p3) target bundleno = 242 (0xf2), region = 32  ;;  %p204_p4 = scmp.lt.s32.totalorder (!%p170_p3), %s779_s24, 63 }
   0xc   : > { %v904_v0 = vld [vmem:[%s1234_s1 + $0x38] sm:$0xff]  ;;  %v903_v1 = vld [vmem:[%s1234_s1 + $0x30] sm:$0xff]  ;;  %v902_v2 = vld [vmem:[%s1234_s1 + $0x28] sm:$0xff]  ;;  %s1242_s24 = smov (!%p204_p4, %s779_s24), 63 }
   0xd   : > { %421 = vmatpush.bf16.msra.mxu0 %v904_v0  ;;  %1000 = vmatpush.bf16.msra.mxu1 %v904_v0  ;;  %v901_v3 = vld [vmem:[%s1234_s1 + $0x20] sm:$0xff]  ;;  %v900_v4 = vld [vmem:[%s1234_s1 + $0x18] sm:$0xff]  ;;  %v899_v5 = vld [vmem:[%s1234_s1 + $0x10] sm:$0xff]  ;;  %s780_s4 = sshll.u32 %s1242_s24, 2 }
   0xe   : > { %1001 = vmatpush.bf16.msra.mxu2 %v904_v0  ;;  %1002 = vmatpush.bf16.msra.mxu3 %v904_v0  ;;  %v898_v6 = vld [vmem:[%s1234_s1 + $0x8] sm:$0xff]  ;;  %v897_v7 = vld [vmem:[%s1234_s1] sm:$0xff]  ;;  %s1146_s9 = scalar_lea.vmem %s1233_s0, %s780_s4  ;;  %s1180_s17 = scalar_lea.vmem %s1236_s3, %s780_s4 }
   0xf   : > { %v881_v8 = vld [vmem:[%s1146_s9] sm:$0xff]  ;;  %v882_v12 = vld [vmem:[%s1146_s9 + $0x8] sm:$0xff]  ;;  %v883_v16 = vld [vmem:[%s1146_s9 + $0x10] sm:$0xff] }
  0x10   : > { %v885_v9 = vld [vmem:[%s1146_s9 + $0x20] sm:$0xff]  ;;  %v886_v13 = vld [vmem:[%s1146_s9 + $0x28] sm:$0xff]  ;;  %v887_v17 = vld [vmem:[%s1146_s9 + $0x30] sm:$0xff] }
  0x11   : > { %422 = vmatpush.bf16.msra.mxu0 %v903_v1  ;;  %1003 = vmatpush.bf16.msra.mxu1 %v903_v1  ;;  %v889_v10 = vld [vmem:[%s1146_s9 + $0x40] sm:$0xff]  ;;  %v890_v14 = vld [vmem:[%s1146_s9 + $0x48] sm:$0xff]  ;;  %v891_v18 = vld [vmem:[%s1146_s9 + $0x50] sm:$0xff] }
  0x12   : > { %1004 = vmatpush.bf16.msra.mxu2 %v903_v1  ;;  %1005 = vmatpush.bf16.msra.mxu3 %v903_v1  ;;  %v893_v11 = vld [vmem:[%s1146_s9 + $0x60] sm:$0xff]  ;;  %v894_v15 = vld [vmem:[%s1146_s9 + $0x68] sm:$0xff]  ;;  %v895_v19 = vld [vmem:[%s1146_s9 + $0x70] sm:$0xff] }
  0x13   : > { %v884_v20 = vld [vmem:[%s1146_s9 + $0x18] sm:$0xff]  ;;  %v1167_v26 = vld [vmem:[%s1235_s2] ss:$0 sm:$0xff] }
  0x14   : > { %v888_v21 = vld [vmem:[%s1146_s9 + $0x38] sm:$0xff] }
  0x15   : > { %423 = vmatpush.bf16.msra.mxu0 %v902_v2  ;;  %1006 = vmatpush.bf16.msra.mxu1 %v902_v2  ;;  %v892_v22 = vld [vmem:[%s1146_s9 + $0x58] sm:$0xff] }
  0x16   : > { %1007 = vmatpush.bf16.msra.mxu2 %v902_v2  ;;  %1008 = vmatpush.bf16.msra.mxu3 %v902_v2  ;;  %v896_v23 = vld [vmem:[%s1146_s9 + $0x78] sm:$0xff] }
  0x19   : > { %424 = vmatpush.bf16.msra.mxu0 %v901_v3  ;;  %1009 = vmatpush.bf16.msra.mxu1 %v901_v3 }
  0x1a   : > { %1010 = vmatpush.bf16.msra.mxu2 %v901_v3  ;;  %1011 = vmatpush.bf16.msra.mxu3 %v901_v3 }
  0x1d   : > { %425 = vmatpush.bf16.msra.mxu0 %v900_v4  ;;  %1012 = vmatpush.bf16.msra.mxu1 %v900_v4 }
  0x1e   : > { %1013 = vmatpush.bf16.msra.mxu2 %v900_v4  ;;  %1014 = vmatpush.bf16.msra.mxu3 %v900_v4 }
  0x21   : > { %426 = vmatpush.bf16.msra.mxu0 %v899_v5  ;;  %1015 = vmatpush.bf16.msra.mxu1 %v899_v5 }
  0x22   : > { %1016 = vmatpush.bf16.msra.mxu2 %v899_v5  ;;  %1017 = vmatpush.bf16.msra.mxu3 %v899_v5 }
  0x25   : > { %427 = vmatpush.bf16.msra.mxu0 %v898_v6  ;;  %1018 = vmatpush.bf16.msra.mxu1 %v898_v6 }
  0x26   : > { %1019 = vmatpush.bf16.msra.mxu2 %v898_v6  ;;  %1020 = vmatpush.bf16.msra.mxu3 %v898_v6 }
  0x29   : > { %428 = vmatpush.bf16.msra.mxu0 %v897_v7  ;;  %1021 = vmatpush.bf16.msra.mxu1 %v897_v7 }
  0x2a   : > { %1022 = vmatpush.bf16.msra.mxu2 %v897_v7  ;;  %1023 = vmatpush.bf16.msra.mxu3 %v897_v7 }
  0x2c   : > { %429 = vmatmul.bf16.vlgmr.msra.gmra.mxu0 %v881_v8  ;;  %449 = vmatmul.bf16.vlgmr.msra.gmra.mxu1 %v885_v9 }
  0x2d   : > { %469 = vmatmul.bf16.vlgmr.msra.gmra.mxu2 %v889_v10  ;;  %489 = vmatmul.bf16.vlgmr.msra.gmra.mxu3 %v893_v11 }
  0x3c   : > { %434 = vmatmul.bf16.gmra.mxu0 %v882_v12  ;;  %454 = vmatmul.bf16.gmra.mxu1 %v886_v13 }
  0x3d   : > { %474 = vmatmul.bf16.gmra.mxu2 %v890_v14  ;;  %494 = vmatmul.bf16.gmra.mxu3 %v894_v15 }
  0x4c   : > { %439 = vmatmul.bf16.gmra.mxu0 %v883_v16  ;;  %459 = vmatmul.bf16.gmra.mxu1 %v887_v17 }
  0x4d   : > { %479 = vmatmul.bf16.gmra.mxu2 %v891_v18  ;;  %499 = vmatmul.bf16.gmra.mxu3 %v895_v19 }
  0x5c   : > { %444 = vmatmul.bf16.gmra.mxu0 %v884_v20  ;;  %464 = vmatmul.bf16.gmra.mxu1 %v888_v21 }
  0x5d   : > { %484 = vmatmul.bf16.gmra.mxu2 %v892_v22  ;;  %504 = vmatmul.bf16.gmra.mxu3 %v896_v23 }
  0xa9   : > { %v430_v24 = vpop.f32.mrf.mxu0  ;;  %v450_v25 = vpop.f32.mrf.mxu1 }
  0xaa   : > { %v431_v27 = vadd.f32 %v1167_v26, %v430_v24  ;;  %v451_v28 = vadd.f32 %v1167_v26, %v450_v25 }
  0xac   : > { %v542_v33 = vmul.f32 0.2, %v431_v27  ;;  %v550_v34 = vmul.f32 0.2, %v451_v28  ;;  %vm510_vm0 = vcmp.ge.f32.partialorder %v431_v27, 0.0  ;;  %vm518_vm1 = vcmp.ge.f32.partialorder %v451_v28, 0.0 }
  0xae   : > { %v574_v41 = vsel %vm510_vm0, %v431_v27, %v542_v33  ;;  %v582_v42 = vsel %vm518_vm1, %v451_v28, %v550_v34 }
  0xb0   : > { %v470_v29 = vpop.f32.mrf.mxu2  ;;  %v490_v30 = vpop.f32.mrf.mxu3 }
  0xb1   : > { %v432_v31 = vpop.f32.mrf.mxu0  ;;  %v452_v32 = vpop.f32.mrf.mxu1  ;;  %v471_v39 = vadd.f32 %v1167_v26, %v470_v29  ;;  %v491_v40 = vadd.f32 %v1167_v26, %v490_v30 }
  0xb2   : > { %v433_v35 = vadd.f32 %v1167_v26, %v432_v31  ;;  %v453_v36 = vadd.f32 %v1167_v26, %v452_v32 }
  0xb3   : > { %v558_v49 = vmul.f32 0.2, %v471_v39  ;;  %v566_v50 = vmul.f32 0.2, %v491_v40  ;;  %vm526_vm4 = vcmp.ge.f32.partialorder %v471_v39, 0.0  ;;  %vm534_vm5 = vcmp.ge.f32.partialorder %v491_v40, 0.0 }
  0xb4   : > { %vm511_vm2 = vcmp.ge.f32.partialorder %v433_v35, 0.0  ;;  %v543_v37 = vmul.f32 0.2, %v433_v35  ;;  %vm519_vm3 = vcmp.ge.f32.partialorder %v453_v36, 0.0  ;;  %v551_v38 = vmul.f32 0.2, %v453_v36 }
  0xb5   : > { %v590_v57 = vsel %vm526_vm4, %v471_v39, %v558_v49  ;;  %v598_v58 = vsel %vm534_vm5, %v491_v40, %v566_v50 }
  0xb6   : > { %v575_v43 = vsel %vm511_vm2, %v433_v35, %v543_v37  ;;  %v583_v44 = vsel %vm519_vm3, %v453_v36, %v551_v38 }
  0xb7   : > { %v908_v45 = vpack.c.bf16 %v575_v43, %v574_v41  ;;  %v928_v46 = vpack.c.bf16 %v583_v44, %v582_v42 }
  0xb8   : > { %v472_v47 = vpop.f32.mrf.mxu2  ;;  %v492_v48 = vpop.f32.mrf.mxu3 }
  0xb9   : > { %909 = vst [vmem:[%s1180_s17] sm:$0xff] %v908_v45   ;;  %v473_v51 = vadd.f32 %v1167_v26, %v472_v47  ;;  %v493_v52 = vadd.f32 %v1167_v26, %v492_v48  ;;  %v435_v53 = vpop.f32.mrf.mxu0  ;;  %v455_v54 = vpop.f32.mrf.mxu1 }
  0xba   : > { %988 = vst [vmem:[%s1180_s17 + $0x20] sm:$0xff] %v928_v46   ;;  %v436_v63 = vadd.f32 %v1167_v26, %v435_v53  ;;  %v456_v0 = vadd.f32 %v1167_v26, %v455_v54 }
  0xbb   : > { %vm527_vm6 = vcmp.ge.f32.partialorder %v473_v51, 0.0  ;;  %v559_v55 = vmul.f32 0.2, %v473_v51  ;;  %vm535_vm7 = vcmp.ge.f32.partialorder %v493_v52, 0.0  ;;  %v567_v56 = vmul.f32 0.2, %v493_v52 }
  0xbc   : > { %v544_v5 = vmul.f32 0.2, %v436_v63  ;;  %v552_v6 = vmul.f32 0.2, %v456_v0  ;;  %vm512_vm8 = vcmp.ge.f32.partialorder %v436_v63, 0.0  ;;  %vm520_vm9 = vcmp.ge.f32.partialorder %v456_v0, 0.0 }
  0xbd   : > { %v591_v59 = vsel %vm527_vm6, %v473_v51, %v559_v55  ;;  %v599_v60 = vsel %vm535_vm7, %v493_v52, %v567_v56 }
  0xbe   : > { %v948_v61 = vpack.c.bf16 %v591_v59, %v590_v57  ;;  %v968_v62 = vpack.c.bf16 %v599_v60, %v598_v58  ;;  %v576_v13 = vsel %vm512_vm8, %v436_v63, %v544_v5  ;;  %v584_v14 = vsel %vm520_vm9, %v456_v0, %v552_v6 }
  0xc0   : > { %992 = vst [vmem:[%s1180_s17 + $0x40] sm:$0xff] %v948_v61   ;;  %v475_v1 = vpop.f32.mrf.mxu2  ;;  %v495_v2 = vpop.f32.mrf.mxu3 }
  0xc1   : > { %996 = vst [vmem:[%s1180_s17 + $0x60] sm:$0xff] %v968_v62   ;;  %v437_v3 = vpop.f32.mrf.mxu0  ;;  %v457_v4 = vpop.f32.mrf.mxu1  ;;  %v476_v11 = vadd.f32 %v1167_v26, %v475_v1  ;;  %v496_v12 = vadd.f32 %v1167_v26, %v495_v2 }
  0xc2   : > { %v438_v7 = vadd.f32 %v1167_v26, %v437_v3  ;;  %v458_v8 = vadd.f32 %v1167_v26, %v457_v4 }
  0xc3   : > { %v560_v21 = vmul.f32 0.2, %v476_v11  ;;  %v568_v22 = vmul.f32 0.2, %v496_v12  ;;  %vm528_vm12 = vcmp.ge.f32.partialorder %v476_v11, 0.0  ;;  %vm536_vm13 = vcmp.ge.f32.partialorder %v496_v12, 0.0 }
  0xc4   : > { %vm513_vm10 = vcmp.ge.f32.partialorder %v438_v7, 0.0  ;;  %v545_v9 = vmul.f32 0.2, %v438_v7  ;;  %vm521_vm11 = vcmp.ge.f32.partialorder %v458_v8, 0.0  ;;  %v553_v10 = vmul.f32 0.2, %v458_v8 }
  0xc5   : > { %v592_v30 = vsel %vm528_vm12, %v476_v11, %v560_v21  ;;  %v600_v31 = vsel %vm536_vm13, %v496_v12, %v568_v22 }
  0xc6   : > { %v577_v15 = vsel %vm513_vm10, %v438_v7, %v545_v9  ;;  %v585_v16 = vsel %vm521_vm11, %v458_v8, %v553_v10 }
  0xc7   : > { %v913_v17 = vpack.c.bf16 %v577_v15, %v576_v13  ;;  %v933_v18 = vpack.c.bf16 %v585_v16, %v584_v14 }
  0xc8   : > { %v477_v19 = vpop.f32.mrf.mxu2  ;;  %v497_v20 = vpop.f32.mrf.mxu3 }
  0xc9   : > { %985 = vst [vmem:[%s1180_s17 + $0x8] sm:$0xff] %v913_v17   ;;  %v478_v23 = vadd.f32 %v1167_v26, %v477_v19  ;;  %v498_v24 = vadd.f32 %v1167_v26, %v497_v20  ;;  %v440_v25 = vpop.f32.mrf.mxu0  ;;  %v460_v27 = vpop.f32.mrf.mxu1 }
  0xca   : > { %989 = vst [vmem:[%s1180_s17 + $0x28] sm:$0xff] %v933_v18   ;;  %v441_v36 = vadd.f32 %v1167_v26, %v440_v25  ;;  %v461_v37 = vadd.f32 %v1167_v26, %v460_v27 }
  0xcb   : > { %vm529_vm14 = vcmp.ge.f32.partialorder %v478_v23, 0.0  ;;  %v561_v28 = vmul.f32 0.2, %v478_v23  ;;  %vm537_vm15 = vcmp.ge.f32.partialorder %v498_v24, 0.0  ;;  %v569_v29 = vmul.f32 0.2, %v498_v24 }
  0xcc   : > { %v546_v42 = vmul.f32 0.2, %v441_v36  ;;  %v554_v43 = vmul.f32 0.2, %v461_v37  ;;  %vm514_vm0 = vcmp.ge.f32.partialorder %v441_v36, 0.0  ;;  %vm522_vm1 = vcmp.ge.f32.partialorder %v461_v37, 0.0 }
  0xcd   : > { %v593_v32 = vsel %vm529_vm14, %v478_v23, %v561_v28  ;;  %v601_v33 = vsel %vm537_vm15, %v498_v24, %v569_v29 }
  0xce   : > { %v953_v34 = vpack.c.bf16 %v593_v32, %v592_v30  ;;  %v973_v35 = vpack.c.bf16 %v601_v33, %v600_v31  ;;  %v578_v50 = vsel %vm514_vm0, %v441_v36, %v546_v42  ;;  %v586_v51 = vsel %vm522_vm1, %v461_v37, %v554_v43 }
  0xd0   : > { %993 = vst [vmem:[%s1180_s17 + $0x48] sm:$0xff] %v953_v34   ;;  %v480_v38 = vpop.f32.mrf.mxu2  ;;  %v500_v39 = vpop.f32.mrf.mxu3 }
  0xd1   : > { %997 = vst [vmem:[%s1180_s17 + $0x68] sm:$0xff] %v973_v35   ;;  %v442_v40 = vpop.f32.mrf.mxu0  ;;  %v462_v41 = vpop.f32.mrf.mxu1  ;;  %v481_v48 = vadd.f32 %v1167_v26, %v480_v38  ;;  %v501_v49 = vadd.f32 %v1167_v26, %v500_v39 }
  0xd2   : > { %v443_v44 = vadd.f32 %v1167_v26, %v442_v40  ;;  %v463_v45 = vadd.f32 %v1167_v26, %v462_v41 }
  0xd3   : > { %v562_v58 = vmul.f32 0.2, %v481_v48  ;;  %v570_v59 = vmul.f32 0.2, %v501_v49  ;;  %vm530_vm4 = vcmp.ge.f32.partialorder %v481_v48, 0.0  ;;  %vm538_vm5 = vcmp.ge.f32.partialorder %v501_v49, 0.0 }
  0xd4   : > { %vm515_vm2 = vcmp.ge.f32.partialorder %v443_v44, 0.0  ;;  %v547_v46 = vmul.f32 0.2, %v443_v44  ;;  %vm523_vm3 = vcmp.ge.f32.partialorder %v463_v45, 0.0  ;;  %v555_v47 = vmul.f32 0.2, %v463_v45 }
  0xd5   : > { %v594_v2 = vsel %vm530_vm4, %v481_v48, %v562_v58  ;;  %v602_v3 = vsel %vm538_vm5, %v501_v49, %v570_v59 }
  0xd6   : > { %v579_v52 = vsel %vm515_vm2, %v443_v44, %v547_v46  ;;  %v587_v53 = vsel %vm523_vm3, %v463_v45, %v555_v47 }
  0xd7   : > { %v918_v54 = vpack.c.bf16 %v579_v52, %v578_v50  ;;  %v938_v55 = vpack.c.bf16 %v587_v53, %v586_v51 }
  0xd8   : > { %v482_v56 = vpop.f32.mrf.mxu2  ;;  %v502_v57 = vpop.f32.mrf.mxu3 }
  0xd9   : > { %986 = vst [vmem:[%s1180_s17 + $0x10] sm:$0xff] %v918_v54   ;;  %v483_v60 = vadd.f32 %v1167_v26, %v482_v56  ;;  %v503_v61 = vadd.f32 %v1167_v26, %v502_v57  ;;  %v445_v62 = vpop.f32.mrf.mxu0  ;;  %v465_v63 = vpop.f32.mrf.mxu1 }
  0xda   : > { %990 = vst [vmem:[%s1180_s17 + $0x30] sm:$0xff] %v938_v55   ;;  %v446_v8 = vadd.f32 %v1167_v26, %v445_v62  ;;  %v466_v9 = vadd.f32 %v1167_v26, %v465_v63 }
  0xdb   : > { %vm531_vm6 = vcmp.ge.f32.partialorder %v483_v60, 0.0  ;;  %v563_v0 = vmul.f32 0.2, %v483_v60  ;;  %vm539_vm7 = vcmp.ge.f32.partialorder %v503_v61, 0.0  ;;  %v571_v1 = vmul.f32 0.2, %v503_v61 }
  0xdc   : > { %v548_v14 = vmul.f32 0.2, %v446_v8  ;;  %v556_v15 = vmul.f32 0.2, %v466_v9  ;;  %vm516_vm8 = vcmp.ge.f32.partialorder %v446_v8, 0.0  ;;  %vm524_vm9 = vcmp.ge.f32.partialorder %v466_v9, 0.0 }
  0xdd   : > { %v595_v4 = vsel %vm531_vm6, %v483_v60, %v563_v0  ;;  %v603_v5 = vsel %vm539_vm7, %v503_v61, %v571_v1 }
  0xde   : > { %v958_v6 = vpack.c.bf16 %v595_v4, %v594_v2  ;;  %v978_v7 = vpack.c.bf16 %v603_v5, %v602_v3  ;;  %v580_v22 = vsel %vm516_vm8, %v446_v8, %v548_v14  ;;  %v588_v23 = vsel %vm524_vm9, %v466_v9, %v556_v15 }
  0xe0   : > { %994 = vst [vmem:[%s1180_s17 + $0x50] sm:$0xff] %v958_v6   ;;  %v485_v10 = vpop.f32.mrf.mxu2  ;;  %v505_v11 = vpop.f32.mrf.mxu3 }
  0xe1   : > { %998 = vst [vmem:[%s1180_s17 + $0x70] sm:$0xff] %v978_v7   ;;  %v447_v12 = vpop.f32.mrf.mxu0  ;;  %v467_v13 = vpop.f32.mrf.mxu1  ;;  %v486_v20 = vadd.f32 %v1167_v26, %v485_v10  ;;  %v506_v21 = vadd.f32 %v1167_v26, %v505_v11 }
  0xe2   : > { %v448_v16 = vadd.f32 %v1167_v26, %v447_v12  ;;  %v468_v17 = vadd.f32 %v1167_v26, %v467_v13 }
  0xe3   : > { %v564_v31 = vmul.f32 0.2, %v486_v20  ;;  %v572_v32 = vmul.f32 0.2, %v506_v21  ;;  %vm532_vm12 = vcmp.ge.f32.partialorder %v486_v20, 0.0  ;;  %vm540_vm13 = vcmp.ge.f32.partialorder %v506_v21, 0.0 }
  0xe4   : > { %vm517_vm10 = vcmp.ge.f32.partialorder %v448_v16, 0.0  ;;  %v549_v18 = vmul.f32 0.2, %v448_v16  ;;  %vm525_vm11 = vcmp.ge.f32.partialorder %v468_v17, 0.0  ;;  %v557_v19 = vmul.f32 0.2, %v468_v17 }
  0xe5   : > { %v596_v37 = vsel %vm532_vm12, %v486_v20, %v564_v31  ;;  %v604_v38 = vsel %vm540_vm13, %v506_v21, %v572_v32 }
  0xe6   : > { %v581_v24 = vsel %vm517_vm10, %v448_v16, %v549_v18  ;;  %v589_v25 = vsel %vm525_vm11, %v468_v17, %v557_v19 }
  0xe7   : > { %v923_v27 = vpack.c.bf16 %v581_v24, %v580_v22  ;;  %v943_v28 = vpack.c.bf16 %v589_v25, %v588_v23 }
  0xe8   : > { %v487_v29 = vpop.f32.mrf.mxu2  ;;  %v507_v30 = vpop.f32.mrf.mxu3 }
  0xe9   : > { %987 = vst [vmem:[%s1180_s17 + $0x18] sm:$0xff] %v923_v27   ;;  %v488_v33 = vadd.f32 %v1167_v26, %v487_v29  ;;  %v508_v34 = vadd.f32 %v1167_v26, %v507_v30 }
  0xea   : > { %991 = vst [vmem:[%s1180_s17 + $0x38] sm:$0xff] %v943_v28  }
  0xeb   : > { %vm533_vm14 = vcmp.ge.f32.partialorder %v488_v33, 0.0  ;;  %v565_v35 = vmul.f32 0.2, %v488_v33  ;;  %vm541_vm15 = vcmp.ge.f32.partialorder %v508_v34, 0.0  ;;  %v573_v36 = vmul.f32 0.2, %v508_v34 }
  0xed   : > { %v597_v39 = vsel %vm533_vm14, %v488_v33, %v565_v35  ;;  %v605_v40 = vsel %vm541_vm15, %v508_v34, %v573_v36 }
  0xee   : > { %v963_v41 = vpack.c.bf16 %v597_v39, %v596_v37  ;;  %v983_v42 = vpack.c.bf16 %v605_v40, %v604_v38 }
  0xf0   : > { %995 = vst [vmem:[%s1180_s17 + $0x58] sm:$0xff] %v963_v41  }
  0xf1   : > { %999 = vst [vmem:[%s1180_s17 + $0x78] sm:$0xff] %v983_v42  }
  0xf2 PF: > { %s13_s14 = sadd.s32 1, %s1071_s14   ;;  %s1237_s12 = smov %s1067_s13 }
  0xf3   : > { %p10_p5 = scmp.ge.s32.totalorder %s13_s14, 4   ;;  %s1238_s13 = smov %s1240_s15 }
  0xf5   :  { %12 = sbr.rel (!%p10_p5) target bundleno = 2 (0x2), region = 68 }

// kernel: _lambda_.10
= control target key start
LH: loop header
LB: loop body
LE: loop exit
PB: predicated region body
PF: predicated region fallthrough
CT: control target
= control target key end

     0   :  { %s368_s0 = inlined_call_operand.vmem [shape: bf16[128,128], index: 0, kind: input, shape index: {}]   ;;  %s369_s1 = inlined_call_operand.vmem [shape: f32[1,128], index: 1, kind: input, shape index: {}]   ;;  %s370_s2 = inlined_call_operand.vmem [shape: f32[1,128], index: 2, kind: input, shape index: {}]   ;;  %s371_s3 = inlined_call_operand.vmem [shape: bf16[128,128], index: 3, kind: output, shape index: {}]  }
   0x1   :  { %v171_v0 = vld [vmem:[%s368_s0] sm:$0xff]   ;;  %v242_v5 = vld [vmem:[%s368_s0 + $0x8] sm:$0xff]   ;;  %v243_v8 = vld [vmem:[%s368_s0 + $0x10] sm:$0xff]  }
   0x2   :  { %v284_v1 = vld [vmem:[%s369_s1] ss:$0 sm:$0xff]  ;;  %v172_v2 = vunpack.c.l.bf16 %v171_v0  ;;  %v173_v3 = vunpack.c.h.bf16 %v171_v0  ;;  %v176_v6 = vunpack.c.l.bf16 %v242_v5  ;;  %v177_v7 = vunpack.c.h.bf16 %v242_v5  ;;  %v244_v9 = vld [vmem:[%s368_s0 + $0x18] sm:$0xff]   ;;  %v246_v39 = vld [vmem:[%s368_s0 + $0x28] sm:$0xff]  }
   0x3   :  { %v289_v4 = vld [vmem:[%s370_s2] ss:$0 sm:$0xff]  ;;  %v180_v12 = vunpack.c.l.bf16 %v243_v8  ;;  %v181_v13 = vunpack.c.h.bf16 %v243_v8  ;;  %v184_v16 = vunpack.c.l.bf16 %v244_v9  ;;  %v185_v17 = vunpack.c.h.bf16 %v244_v9  ;;  %v247_v49 = vld [vmem:[%s368_s0 + $0x30] sm:$0xff]   ;;  %v248_v57 = vld [vmem:[%s368_s0 + $0x38] sm:$0xff]  }
   0x4   :  { %v50_v10 = vmul.f32 %v284_v1, %v172_v2  ;;  %v51_v11 = vmul.f32 %v284_v1, %v173_v3  ;;  %v52_v14 = vmul.f32 %v284_v1, %v176_v6  ;;  %v53_v15 = vmul.f32 %v284_v1, %v177_v7  ;;  %v245_v38 = vld [vmem:[%s368_s0 + $0x20] sm:$0xff]  }
   0x5   :  { %v54_v20 = vmul.f32 %v284_v1, %v180_v12  ;;  %v55_v21 = vmul.f32 %v284_v1, %v181_v13  ;;  %v56_v24 = vmul.f32 %v284_v1, %v184_v16  ;;  %v57_v25 = vmul.f32 %v284_v1, %v185_v17 }
   0x6   :  { %v70_v18 = vadd.f32 %v289_v4, %v50_v10  ;;  %v71_v19 = vadd.f32 %v289_v4, %v51_v11  ;;  %v72_v22 = vadd.f32 %v289_v4, %v52_v14  ;;  %v73_v23 = vadd.f32 %v289_v4, %v53_v15 }
   0x7   :  { %v74_v32 = vadd.f32 %v289_v4, %v54_v20  ;;  %v75_v33 = vadd.f32 %v289_v4, %v55_v21  ;;  %v76_v37 = vadd.f32 %v289_v4, %v56_v24  ;;  %v77_v43 = vadd.f32 %v289_v4, %v57_v25 }
   0x8   :  { %vm86_vm0 = vcmp.ge.f32.partialorder %v70_v18, 0.0  ;;  %vm87_vm1 = vcmp.ge.f32.partialorder %v71_v19, 0.0  ;;  %v102_v26 = vmul.f32 0.2, %v70_v18  ;;  %v103_v27 = vmul.f32 0.2, %v71_v19 }
   0x9   :  { %vm88_vm2 = vcmp.ge.f32.partialorder %v72_v22, 0.0  ;;  %vm89_vm3 = vcmp.ge.f32.partialorder %v73_v23, 0.0  ;;  %v104_v28 = vmul.f32 0.2, %v72_v22  ;;  %v105_v29 = vmul.f32 0.2, %v73_v23 }
   0xa   :  { %v118_v30 = vsel %vm86_vm0, %v70_v18, %v102_v26  ;;  %v119_v31 = vsel %vm87_vm1, %v71_v19, %v103_v27  ;;  %vm90_vm4 = vcmp.ge.f32.partialorder %v74_v32, 0.0  ;;  %vm91_vm5 = vcmp.ge.f32.partialorder %v75_v33, 0.0 }
   0xb   :  { %v205_v34 = vpack.c.bf16 %v119_v31, %v118_v30  ;;  %v120_v35 = vsel %vm88_vm2, %v72_v22, %v104_v28  ;;  %v121_v36 = vsel %vm89_vm3, %v73_v23, %v105_v29  ;;  %v106_v41 = vmul.f32 0.2, %v74_v32 }
   0xc   :  { %v210_v40 = vpack.c.bf16 %v121_v36, %v120_v35  ;;  %v107_v42 = vmul.f32 0.2, %v75_v33  ;;  %vm92_vm6 = vcmp.ge.f32.partialorder %v76_v37, 0.0  ;;  %v108_v44 = vmul.f32 0.2, %v76_v37 }
   0xd   :  { %206 = vst [vmem:[%s371_s3] sm:$0xff] %v205_v34   ;;  %v122_v45 = vsel %vm90_vm4, %v74_v32, %v106_v41  ;;  %v188_v46 = vunpack.c.l.bf16 %v245_v38  ;;  %v189_v47 = vunpack.c.h.bf16 %v245_v38  ;;  %v192_v48 = vunpack.c.l.bf16 %v246_v39 }
   0xe   :  { %249 = vst [vmem:[%s371_s3 + $0x8] sm:$0xff] %v210_v40   ;;  %v123_v50 = vsel %vm91_vm5, %v75_v33, %v107_v42  ;;  %vm93_vm7 = vcmp.ge.f32.partialorder %v77_v43, 0.0  ;;  %v109_v51 = vmul.f32 0.2, %v77_v43  ;;  %v124_v52 = vsel %vm92_vm6, %v76_v37, %v108_v44 }
   0xf   :  { %v215_v53 = vpack.c.bf16 %v123_v50, %v122_v45  ;;  %v58_v54 = vmul.f32 %v284_v1, %v188_v46  ;;  %v59_v55 = vmul.f32 %v284_v1, %v189_v47  ;;  %v193_v56 = vunpack.c.h.bf16 %v246_v39 }
  0x10   :  { %v125_v58 = vsel %vm93_vm7, %v77_v43, %v109_v51  ;;  %v60_v59 = vmul.f32 %v284_v1, %v192_v48  ;;  %v196_v60 = vunpack.c.l.bf16 %v247_v49  ;;  %v197_v61 = vunpack.c.h.bf16 %v247_v49 }
  0x11   :  { %250 = vst [vmem:[%s371_s3 + $0x10] sm:$0xff] %v215_v53   ;;  %v220_v62 = vpack.c.bf16 %v125_v58, %v124_v52  ;;  %v78_v63 = vadd.f32 %v289_v4, %v58_v54  ;;  %v79_v0 = vadd.f32 %v289_v4, %v59_v55  ;;  %v61_v2 = vmul.f32 %v284_v1, %v193_v56 }
  0x12   :  { %v80_v3 = vadd.f32 %v289_v4, %v60_v59  ;;  %v62_v5 = vmul.f32 %v284_v1, %v196_v60  ;;  %v63_v6 = vmul.f32 %v284_v1, %v197_v61  ;;  %v200_v7 = vunpack.c.l.bf16 %v248_v57 }
  0x13   :  { %251 = vst [vmem:[%s371_s3 + $0x18] sm:$0xff] %v220_v62   ;;  %vm94_vm8 = vcmp.ge.f32.partialorder %v78_v63, 0.0  ;;  %vm95_vm9 = vcmp.ge.f32.partialorder %v79_v0, 0.0  ;;  %v110_v8 = vmul.f32 0.2, %v78_v63  ;;  %v81_v9 = vadd.f32 %v289_v4, %v61_v2 }
  0x14   :  { %v111_v10 = vmul.f32 0.2, %v79_v0  ;;  %vm96_vm10 = vcmp.ge.f32.partialorder %v80_v3, 0.0  ;;  %v112_v11 = vmul.f32 0.2, %v80_v3  ;;  %v82_v12 = vadd.f32 %v289_v4, %v62_v5 }
  0x15   :  { %v126_v13 = vsel %vm94_vm8, %v78_v63, %v110_v8  ;;  %vm97_vm11 = vcmp.ge.f32.partialorder %v81_v9, 0.0  ;;  %v113_v14 = vmul.f32 0.2, %v81_v9  ;;  %v83_v15 = vadd.f32 %v289_v4, %v63_v6 }
  0x16   :  { %v127_v16 = vsel %vm95_vm9, %v79_v0, %v111_v10  ;;  %v128_v17 = vsel %vm96_vm10, %v80_v3, %v112_v11  ;;  %vm98_vm12 = vcmp.ge.f32.partialorder %v82_v12, 0.0  ;;  %v114_v18 = vmul.f32 0.2, %v82_v12 }
  0x17   :  { %v225_v19 = vpack.c.bf16 %v127_v16, %v126_v13  ;;  %v129_v20 = vsel %vm97_vm11, %v81_v9, %v113_v14  ;;  %vm99_vm13 = vcmp.ge.f32.partialorder %v83_v15, 0.0  ;;  %v115_v21 = vmul.f32 0.2, %v83_v15 }
  0x18   :  { %v230_v22 = vpack.c.bf16 %v129_v20, %v128_v17  ;;  %v130_v23 = vsel %vm98_vm12, %v82_v12, %v114_v18  ;;  %v201_v24 = vunpack.c.h.bf16 %v248_v57  ;;  %v64_v25 = vmul.f32 %v284_v1, %v200_v7 }
  0x19   :  { %252 = vst [vmem:[%s371_s3 + $0x20] sm:$0xff] %v225_v19   ;;  %v131_v26 = vsel %vm99_vm13, %v83_v15, %v115_v21 }
  0x1a   :  { %253 = vst [vmem:[%s371_s3 + $0x28] sm:$0xff] %v230_v22   ;;  %v235_v27 = vpack.c.bf16 %v131_v26, %v130_v23  ;;  %v65_v28 = vmul.f32 %v284_v1, %v201_v24  ;;  %v84_v29 = vadd.f32 %v289_v4, %v64_v25 }
  0x1c   :  { %254 = vst [vmem:[%s371_s3 + $0x30] sm:$0xff] %v235_v27   ;;  %v85_v30 = vadd.f32 %v289_v4, %v65_v28  ;;  %vm100_vm14 = vcmp.ge.f32.partialorder %v84_v29, 0.0  ;;  %v116_v31 = vmul.f32 0.2, %v84_v29 }
  0x1e   :  { %vm101_vm15 = vcmp.ge.f32.partialorder %v85_v30, 0.0  ;;  %v117_v32 = vmul.f32 0.2, %v85_v30  ;;  %v132_v33 = vsel %vm100_vm14, %v84_v29, %v116_v31 }
  0x20   :  { %v133_v34 = vsel %vm101_vm15, %v85_v30, %v117_v32 }
  0x21   :  { %v240_v35 = vpack.c.bf16 %v133_v34, %v132_v33 }
  0x23   :  { %255 = vst [vmem:[%s371_s3 + $0x38] sm:$0xff] %v240_v35  }

// kernel: _lambda_.9
= control target key start
LH: loop header
LB: loop body
LE: loop exit
PB: predicated region body
PF: predicated region fallthrough
CT: control target
= control target key end

     0   :  { %s893_s12 = smov 0   ;;  %s895_s13 = smov 0   ;;  %s1010_s0 = inlined_call_operand.vmem [shape: bf16[128,256], index: 0, kind: input, shape index: {}]   ;;  %s1011_s1 = inlined_call_operand.vmem [shape: bf16[256,128], index: 1, kind: input, shape index: {}]   ;;  %s1012_s2 = inlined_call_operand.vmem [shape: bf16[128,128], index: 2, kind: output, shape index: {0}]   ;;  %s1013_s3 = inlined_call_operand.vmem [shape: f32[2,2,128], index: 3, kind: output, shape index: {1}]  }
   0x1   :  { %s897_s14 = smov 0  }
   0x2 LB: > { %s26_s15 = sadd.s32 1, %s867_s13  ;;  %p656_p0 = scmp.ge.s32.totalorder %s871_s14, 1  ;;  %s871_s14 = sphi %s897_s14, %s14_s14   ;;  %s867_s13 = sphi %s895_s13, %s1015_s13   ;;  %s863_s12 = sphi %s893_s12, %s1014_s12  }
   0x3   : > { %p28_p1 = scmp.ge.s32.totalorder %s26_s15, 2  ;;  %p167_p2 = scmp.lt.s32.totalorder %s871_s14, 3 }
   0x5   : > { %s1017_s15 = smov (%p28_p1, %s26_s15), 0  ;;  %p168_p3 = pnand %p656_p0, %p167_p2 }
   0x6   : > { %s657_s28 = sshll.u32 (!%p168_p3), %s863_s12, 3  ;;  %p226_p5 = scmp.lt.s32.totalorder (!%p168_p3), %s863_s12, 1 }
   0x7   : > { %171 = sbr.rel (%p168_p3) target bundleno = 223 (0xdf), region = 28  ;;  %p207_p4 = scmp.lt.s32.totalorder (!%p168_p3), %s657_s28, 15 }
   0xc   : > { %v777_v0 = vld [vmem:[%s1011_s1 + $0x38] sm:$0xff]  ;;  %v776_v2 = vld [vmem:[%s1011_s1 + $0x30] sm:$0xff]  ;;  %v775_v4 = vld [vmem:[%s1011_s1 + $0x28] sm:$0xff]  ;;  %s1019_s28 = smov (!%p207_p4, %s657_s28), 15  ;;  %s1021_s12 = smov (!%p226_p5, %s863_s12), 1  ;;  %vm501_vm0 = vcmask 1040384  }
   0xd   : > { %v785_v1 = vld [vmem:[%s1011_s1 + $0x78] sm:$0xff]  ;;  %409 = vmatpush.bf16.msra.mxu0 %v777_v0  ;;  %809 = vmatpush.bf16.msra.mxu2 %v777_v0  ;;  %v784_v3 = vld [vmem:[%s1011_s1 + $0x70] sm:$0xff]  ;;  %v783_v5 = vld [vmem:[%s1011_s1 + $0x68] sm:$0xff]  ;;  %s761_s18 = sshll.u32 %s1019_s28, 3  ;;  %s661_s4 = sshll.u32 %s1019_s28, 2 }
   0xe   : > { %438 = vmatpush.bf16.msra.mxu1 %v785_v1  ;;  %817 = vmatpush.bf16.msra.mxu3 %v785_v1  ;;  %v774_v6 = vld [vmem:[%s1011_s1 + $0x20] sm:$0xff]  ;;  %v773_v8 = vld [vmem:[%s1011_s1 + $0x18] sm:$0xff]  ;;  %v772_v10 = vld [vmem:[%s1011_s1 + $0x10] sm:$0xff]  ;;  %s959_s23 = scalar_lea.vmem %s1010_s0, %s761_s18  ;;  %s990_s7 = scalar_lea.vmem %s1012_s2, %s661_s4 }
   0xf   : > { %v782_v7 = vld [vmem:[%s1011_s1 + $0x60] sm:$0xff]  ;;  %v781_v9 = vld [vmem:[%s1011_s1 + $0x58] sm:$0xff]  ;;  %v780_v11 = vld [vmem:[%s1011_s1 + $0x50] sm:$0xff]  ;;  %s662_s28 = sshll.u32 %s1021_s12, 1 }
  0x10   : > { %v771_v12 = vld [vmem:[%s1011_s1 + $0x8] sm:$0xff]  ;;  %v770_v14 = vld [vmem:[%s1011_s1] sm:$0xff]  ;;  %v673_v28 = vld [vmem:[%s959_s23 + $0x10] sm:$0xf]  ;;  %s232_s10 = scalar_lea.vmem %s1013_s3, %s662_s28 }
  0x11   : > { %410 = vmatpush.bf16.msra.mxu0 %v776_v2  ;;  %810 = vmatpush.bf16.msra.mxu2 %v776_v2  ;;  %v779_v13 = vld [vmem:[%s1011_s1 + $0x48] sm:$0xff]  ;;  %v778_v15 = vld [vmem:[%s1011_s1 + $0x40] sm:$0xff]  ;;  %v765_v29 = vld [vmem:[%s959_s23 + $0x14] sm:$0xf0] }
  0x12   : > { %439 = vmatpush.bf16.msra.mxu1 %v784_v3  ;;  %818 = vmatpush.bf16.msra.mxu3 %v784_v3  ;;  %v665_v16 = vld [vmem:[%s959_s23] sm:$0xf]  ;;  %v763_v17 = vld [vmem:[%s959_s23 + $0x4] sm:$0xf0]  ;;  %v762_v20 = vld [vmem:[%s959_s23 + $0x4] sm:$0xf]  ;;  %v674_v36 = vor.u32 %v765_v29, %v673_v28 }
  0x13   : > { %v681_v18 = vld [vmem:[%s959_s23 + $0x20] sm:$0xf]  ;;  %v767_v19 = vld [vmem:[%s959_s23 + $0x24] sm:$0xf0]  ;;  %v667_v21 = vld [vmem:[%s959_s23 + $0x8] sm:$0xf0]  ;;  %v666_v24 = vor.u32 %v763_v17, %v665_v16 }
  0x14   : > { %v766_v22 = vld [vmem:[%s959_s23 + $0x24] sm:$0xf]  ;;  %v683_v23 = vld [vmem:[%s959_s23 + $0x28] sm:$0xf0]  ;;  %v682_v25 = vor.u32 %v767_v19, %v681_v18  ;;  %v670_v26 = vor.u32 %v762_v20, %v667_v21  ;;  %v689_v30 = vld [vmem:[%s959_s23 + $0x30] sm:$0xf] }
  0x15   : > { %411 = vmatpush.bf16.msra.mxu0 %v775_v4  ;;  %811 = vmatpush.bf16.msra.mxu2 %v775_v4  ;;  %v686_v27 = vor.u32 %v766_v22, %v683_v23  ;;  %v769_v31 = vld [vmem:[%s959_s23 + $0x34] sm:$0xf0]  ;;  %v764_v32 = vld [vmem:[%s959_s23 + $0x14] sm:$0xf]  ;;  %v675_v33 = vld [vmem:[%s959_s23 + $0x18] sm:$0xf0] }
  0x16   : > { %440 = vmatpush.bf16.msra.mxu1 %v783_v5  ;;  %819 = vmatpush.bf16.msra.mxu3 %v783_v5  ;;  %v768_v34 = vld [vmem:[%s959_s23 + $0x34] sm:$0xf]  ;;  %v691_v35 = vld [vmem:[%s959_s23 + $0x38] sm:$0xf0]  ;;  %v690_v37 = vor.u32 %v769_v31, %v689_v30  ;;  %v678_v38 = vor.u32 %v764_v32, %v675_v33 }
  0x17   : > { %v694_v39 = vor.u32 %v768_v34, %v691_v35 }
  0x19   : > { %412 = vmatpush.bf16.msra.mxu0 %v774_v6  ;;  %812 = vmatpush.bf16.msra.mxu2 %v774_v6 }
  0x1a   : > { %441 = vmatpush.bf16.msra.mxu1 %v782_v7  ;;  %820 = vmatpush.bf16.msra.mxu3 %v782_v7 }
  0x1d   : > { %413 = vmatpush.bf16.msra.mxu0 %v773_v8  ;;  %813 = vmatpush.bf16.msra.mxu2 %v773_v8 }
  0x1e   : > { %442 = vmatpush.bf16.msra.mxu1 %v781_v9  ;;  %821 = vmatpush.bf16.msra.mxu3 %v781_v9 }
  0x21   : > { %414 = vmatpush.bf16.msra.mxu0 %v772_v10  ;;  %814 = vmatpush.bf16.msra.mxu2 %v772_v10 }
  0x22   : > { %443 = vmatpush.bf16.msra.mxu1 %v780_v11  ;;  %822 = vmatpush.bf16.msra.mxu3 %v780_v11 }
  0x25   : > { %415 = vmatpush.bf16.msra.mxu0 %v771_v12  ;;  %815 = vmatpush.bf16.msra.mxu2 %v771_v12 }
  0x26   : > { %444 = vmatpush.bf16.msra.mxu1 %v779_v13  ;;  %823 = vmatpush.bf16.msra.mxu3 %v779_v13 }
  0x29   : > { %416 = vmatpush.bf16.msra.mxu0 %v770_v14  ;;  %816 = vmatpush.bf16.msra.mxu2 %v770_v14 }
  0x2a   : > { %445 = vmatpush.bf16.msra.mxu1 %v778_v15  ;;  %824 = vmatpush.bf16.msra.mxu3 %v778_v15 }
  0x2c   : > { %417 = vmatmul.bf16.vlgmr.msra.gmra.mxu0 %v666_v24  ;;  %427 = vmatmul.bf16.vlgmr.msra.gmra.mxu2 %v682_v25 }
  0x2d   : > { %446 = vmatmul.bf16.vlgmr.msra.gmra.mxu1 %v670_v26  ;;  %456 = vmatmul.bf16.vlgmr.msra.gmra.mxu3 %v686_v27 }
  0x3c   : > { %422 = vmatmul.bf16.gmra.mxu0 %v674_v36  ;;  %432 = vmatmul.bf16.gmra.mxu2 %v690_v37 }
  0x3d   : > { %451 = vmatmul.bf16.gmra.mxu1 %v678_v38  ;;  %461 = vmatmul.bf16.gmra.mxu3 %v694_v39 }
  0xa9   : > { %v418_v40 = vpop.f32.mrf.mxu0 }
  0xaa   : > { %v447_v41 = vpop.f32.mrf.mxu1 }
  0xab   : > { %v448_v46 = vadd.f32 %v447_v41, %v418_v40 }
  0xad   : > { %v480_v60 = vmul.f32 %v448_v46, %v448_v46 }
  0xaf   : > { %v428_v42 = vpop.f32.mrf.mxu2 }
  0xb0   : > { %v457_v43 = vpop.f32.mrf.mxu3 }
  0xb1   : > { %v420_v44 = vpop.f32.mrf.mxu0  ;;  %v458_v51 = vadd.f32 %v457_v43, %v428_v42 }
  0xb2   : > { %v449_v45 = vpop.f32.mrf.mxu1 }
  0xb3   : > { %v450_v47 = vadd.f32 %v449_v45, %v420_v44  ;;  %v484_v8 = vmul.f32 %v458_v51, %v458_v51 }
  0xb5   : > { %v789_v48 = vpack.c.bf16 %v450_v47, %v448_v46  ;;  %v481_v57 = vmul.f32 %v450_v47, %v450_v47  ;;  %v467_v61 = vadd.f32 %v450_v47, %v448_v46 }
  0xb7   : > { %790 = vst [vmem:[%s990_s7] sm:$0xff] %v789_v48   ;;  %v430_v49 = vpop.f32.mrf.mxu2  ;;  %v488_v1 = vadd.f32 %v481_v57, %v480_v60 }
  0xb8   : > { %v459_v50 = vpop.f32.mrf.mxu3 }
  0xb9   : > { %v460_v52 = vadd.f32 %v459_v50, %v430_v49  ;;  %v423_v53 = vpop.f32.mrf.mxu0 }
  0xba   : > { %v452_v54 = vpop.f32.mrf.mxu1 }
  0xbb   : > { %v799_v55 = vpack.c.bf16 %v460_v52, %v458_v51  ;;  %v453_v56 = vadd.f32 %v452_v54, %v423_v53  ;;  %v485_v14 = vmul.f32 %v460_v52, %v460_v52 }
  0xbd   : > { %807 = vst [vmem:[%s990_s7 + $0x10] sm:$0xff] %v799_v55   ;;  %v482_v62 = vmul.f32 %v453_v56, %v453_v56  ;;  %v468_v2 = vadd.f32 %v467_v61, %v453_v56 }
  0xbf   : > { %v433_v58 = vpop.f32.mrf.mxu2  ;;  %v489_v4 = vadd.f32 %v488_v1, %v482_v62 }
  0xc0   : > { %v462_v59 = vpop.f32.mrf.mxu3 }
  0xc1   : > { %v425_v63 = vpop.f32.mrf.mxu0  ;;  %v463_v9 = vadd.f32 %v462_v59, %v433_v58 }
  0xc2   : > { %v454_v0 = vpop.f32.mrf.mxu1 }
  0xc3   : > { %v455_v3 = vadd.f32 %v454_v0, %v425_v63  ;;  %v486_v18 = vmul.f32 %v463_v9, %v463_v9 }
  0xc5   : > { %v469_v5 = vadd.f32 %v468_v2, %v455_v3  ;;  %v483_v6 = vmul.f32 %v455_v3, %v455_v3  ;;  %v794_v7 = vpack.c.bf16 %v455_v3, %v453_v56 }
  0xc7   : > { %v470_v10 = vadd.f32 %v469_v5, %v458_v51  ;;  %v490_v11 = vadd.f32 %v489_v4, %v483_v6  ;;  %806 = vst [vmem:[%s990_s7 + $0x8] sm:$0xff] %v794_v7   ;;  %v435_v12 = vpop.f32.mrf.mxu2 }
  0xc8   : > { %v464_v13 = vpop.f32.mrf.mxu3 }
  0xc9   : > { %v491_v15 = vadd.f32 %v490_v11, %v484_v8  ;;  %v465_v16 = vadd.f32 %v464_v13, %v435_v12  ;;  %v471_v17 = vadd.f32 %v470_v10, %v460_v52 }
  0xcb   : > { %v472_v19 = vadd.f32 %v471_v17, %v463_v9  ;;  %v492_v20 = vadd.f32 %v491_v15, %v485_v14  ;;  %v804_v21 = vpack.c.bf16 %v465_v16, %v463_v9  ;;  %v487_v23 = vmul.f32 %v465_v16, %v465_v16 }
  0xcd   : > { %v473_v22 = vadd.f32 %v472_v19, %v465_v16  ;;  %v493_v24 = vadd.f32 %v492_v20, %v486_v18  ;;  %808 = vst [vmem:[%s990_s7 + $0x18] sm:$0xff] %v804_v21  }
  0xcf   : > { %v474_v25 = vrot.slane %v473_v22, 4  ;;  %v494_v26 = vadd.f32 %v493_v24, %v487_v23 }
  0xd1   : > { %v475_v27 = vadd.f32 %v474_v25, %v473_v22  ;;  %v495_v28 = vrot.slane %v494_v26, 4 }
  0xd3   : > { %v476_v29 = vrot.slane %v475_v27, 2  ;;  %v496_v30 = vadd.f32 %v495_v28, %v494_v26 }
  0xd5   : > { %v477_v31 = vadd.f32 %v476_v29, %v475_v27  ;;  %v497_v32 = vrot.slane %v496_v30, 2 }
  0xd7   : > { %v478_v33 = vrot.slane %v477_v31, 1  ;;  %v498_v34 = vadd.f32 %v497_v32, %v496_v30 }
  0xd9   : > { %v499_v35 = vrot.slane %v498_v34, 1  ;;  %v479_v36 = vadd.f32 %v478_v33, %v477_v31 }
  0xdb   : > { %v500_v37 = vadd.f32 %v499_v35, %v498_v34 }
  0xdd   : > { %v502_v38 = vsel %vm501_vm0, %v479_v36, %v500_v37 }
  0xde   : > { %503 = vst [vmem:[%s232_s10] sm:$0x3] %v502_v38 }
  0xdf PF: > { %s14_s14 = sadd.s32 1, %s871_s14   ;;  %s1014_s12 = smov %s867_s13 }
  0xe0   : > { %p11_p6 = scmp.ge.s32.totalorder %s14_s14, 4   ;;  %s1015_s13 = smov %s1017_s15 }
  0xe2   :  { %13 = sbr.rel (!%p11_p6) target bundleno = 2 (0x2), region = 73 }

// kernel: _lambda_.11
= control target key start
LH: loop header
LB: loop body
LE: loop exit
PB: predicated region body
PF: predicated region fallthrough
CT: control target
= control target key end

     0   :  { %s991_s12 = smov 0   ;;  %s993_s13 = smov 0   ;;  %s1132_s0 = inlined_call_operand.vmem [shape: bf16[32,512], index: 0, kind: input, shape index: {}]   ;;  %s1133_s1 = inlined_call_operand.vmem [shape: bf16[512,128], index: 1, kind: input, shape index: {}]   ;;  %s1134_s2 = inlined_call_operand.vmem [shape: bf16[32,128], index: 2, kind: output, shape index: {0}]   ;;  %s1135_s3 = inlined_call_operand.vmem [shape: f32[2,2,128], index: 3, kind: output, shape index: {1}]  }
   0x1   :  { %s995_s14 = smov 0  }
   0x2 LB: > { %s26_s15 = sadd.s32 1, %s965_s13  ;;  %p728_p0 = scmp.ge.s32.totalorder %s969_s14, 1  ;;  %s969_s14 = sphi %s995_s14, %s14_s14   ;;  %s965_s13 = sphi %s993_s13, %s1137_s13   ;;  %s961_s12 = sphi %s991_s12, %s1136_s12  }
   0x3   : > { %p28_p1 = scmp.ge.s32.totalorder %s26_s15, 2  ;;  %p167_p2 = scmp.lt.s32.totalorder %s969_s14, 3 }
   0x5   : > { %s1139_s15 = smov (%p28_p1, %s26_s15), 0  ;;  %p168_p3 = pnand %p728_p0, %p167_p2 }
   0x6   : > { %s729_s17 = sshll.u32 (!%p168_p3), %s961_s12, 1  ;;  %p226_p5 = scmp.lt.s32.totalorder (!%p168_p3), %s961_s12, 1 }
   0x7   : > { %171 = sbr.rel (%p168_p3) target bundleno = 208 (0xd0), region = 28  ;;  %p207_p4 = scmp.lt.s32.totalorder (!%p168_p3), %s729_s17, 3 }
   0xc   : > { %v893_v0 = vld [vmem:[%s1133_s1 + $0x38] sm:$0xff]  ;;  %v892_v4 = vld [vmem:[%s1133_s1 + $0x30] sm:$0xff]  ;;  %v891_v8 = vld [vmem:[%s1133_s1 + $0x28] sm:$0xff]  ;;  %s1141_s17 = smov (!%p207_p4, %s729_s17), 3  ;;  %s1143_s12 = smov (!%p226_p5, %s961_s12), 1  ;;  %vm585_vm0 = vcmask 1040384  }
   0xd   : > { %v901_v1 = vld [vmem:[%s1133_s1 + $0x78] sm:$0xff]  ;;  %513 = vmatpush.bf16.msra.mxu0 %v893_v0  ;;  %v900_v5 = vld [vmem:[%s1133_s1 + $0x70] sm:$0xff]  ;;  %v899_v9 = vld [vmem:[%s1133_s1 + $0x68] sm:$0xff]  ;;  %s881_s20 = sshll.u32 %s1141_s17, 4  ;;  %s733_s18 = sshll.u32 %s1141_s17, 2 }
   0xe   : > { %v909_v2 = vld [vmem:[%s1133_s1 + $0xb8] sm:$0xff]  ;;  %527 = vmatpush.bf16.msra.mxu1 %v901_v1  ;;  %v908_v6 = vld [vmem:[%s1133_s1 + $0xb0] sm:$0xff]  ;;  %v907_v10 = vld [vmem:[%s1133_s1 + $0xa8] sm:$0xff]  ;;  %s211_s27 = scalar_lea.vmem %s1132_s0, %s881_s20  ;;  %s224_s21 = scalar_lea.vmem %s1134_s2, %s733_s18 }
   0xf   : > { %v917_v3 = vld [vmem:[%s1133_s1 + $0xf8] sm:$0xff]  ;;  %541 = vmatpush.bf16.msra.mxu2 %v909_v2  ;;  %v916_v7 = vld [vmem:[%s1133_s1 + $0xf0] sm:$0xff]  ;;  %v915_v11 = vld [vmem:[%s1133_s1 + $0xe8] sm:$0xff]  ;;  %s734_s17 = sshll.u32 %s1143_s12, 1 }
  0x10   : > { %555 = vmatpush.bf16.msra.mxu3 %v917_v3  ;;  %v890_v12 = vld [vmem:[%s1133_s1 + $0x20] sm:$0xff]  ;;  %v889_v16 = vld [vmem:[%s1133_s1 + $0x18] sm:$0xff]  ;;  %v888_v20 = vld [vmem:[%s1133_s1 + $0x10] sm:$0xff]  ;;  %s232_s24 = scalar_lea.vmem %s1135_s3, %s734_s17 }
  0x11   : > { %514 = vmatpush.bf16.msra.mxu0 %v892_v4  ;;  %v898_v13 = vld [vmem:[%s1133_s1 + $0x60] sm:$0xff]  ;;  %v897_v17 = vld [vmem:[%s1133_s1 + $0x58] sm:$0xff]  ;;  %v896_v21 = vld [vmem:[%s1133_s1 + $0x50] sm:$0xff] }
  0x12   : > { %528 = vmatpush.bf16.msra.mxu1 %v900_v5  ;;  %v906_v14 = vld [vmem:[%s1133_s1 + $0xa0] sm:$0xff]  ;;  %v905_v18 = vld [vmem:[%s1133_s1 + $0x98] sm:$0xff]  ;;  %v904_v22 = vld [vmem:[%s1133_s1 + $0x90] sm:$0xff] }
  0x13   : > { %542 = vmatpush.bf16.msra.mxu2 %v908_v6  ;;  %v914_v15 = vld [vmem:[%s1133_s1 + $0xe0] sm:$0xff]  ;;  %v913_v19 = vld [vmem:[%s1133_s1 + $0xd8] sm:$0xff]  ;;  %v912_v23 = vld [vmem:[%s1133_s1 + $0xd0] sm:$0xff] }
  0x14   : > { %556 = vmatpush.bf16.msra.mxu3 %v916_v7  ;;  %v887_v24 = vld [vmem:[%s1133_s1 + $0x8] sm:$0xff]  ;;  %v886_v28 = vld [vmem:[%s1133_s1] sm:$0xff]  ;;  %v884_v33 = vld [vmem:[%s211_s27 + $0xc] sm:$0xf0] }
  0x15   : > { %515 = vmatpush.bf16.msra.mxu0 %v891_v8  ;;  %v895_v25 = vld [vmem:[%s1133_s1 + $0x48] sm:$0xff]  ;;  %v894_v29 = vld [vmem:[%s1133_s1 + $0x40] sm:$0xff]  ;;  %v739_v35 = vld [vmem:[%s211_s27 + $0x10] sm:$0xf0] }
  0x16   : > { %529 = vmatpush.bf16.msra.mxu1 %v899_v9  ;;  %v903_v26 = vld [vmem:[%s1133_s1 + $0x88] sm:$0xff]  ;;  %v902_v30 = vld [vmem:[%s1133_s1 + $0x80] sm:$0xff]  ;;  %v885_v37 = vld [vmem:[%s211_s27 + $0x14] sm:$0xf0] }
  0x17   : > { %543 = vmatpush.bf16.msra.mxu2 %v907_v10  ;;  %v911_v27 = vld [vmem:[%s1133_s1 + $0xc8] sm:$0xff]  ;;  %v910_v31 = vld [vmem:[%s1133_s1 + $0xc0] sm:$0xff]  ;;  %v747_v39 = vld [vmem:[%s211_s27 + $0x18] sm:$0xf0] }
  0x18   : > { %557 = vmatpush.bf16.msra.mxu3 %v915_v11  ;;  %v737_v32 = vld [vmem:[%s211_s27] sm:$0xf]  ;;  %v882_v34 = vld [vmem:[%s211_s27 + $0x4] sm:$0xf]  ;;  %v745_v36 = vld [vmem:[%s211_s27 + $0x8] sm:$0xf] }
  0x19   : > { %516 = vmatpush.bf16.msra.mxu0 %v890_v12  ;;  %v883_v38 = vld [vmem:[%s211_s27 + $0xc] sm:$0xf]  ;;  %v738_v40 = vor.u32 %v884_v33, %v737_v32  ;;  %v742_v41 = vor.u32 %v882_v34, %v739_v35  ;;  %v746_v42 = vor.u32 %v885_v37, %v745_v36 }
  0x1a   : > { %530 = vmatpush.bf16.msra.mxu1 %v898_v13  ;;  %v750_v43 = vor.u32 %v883_v38, %v747_v39 }
  0x1b   : > { %544 = vmatpush.bf16.msra.mxu2 %v906_v14 }
  0x1c   : > { %558 = vmatpush.bf16.msra.mxu3 %v914_v15 }
  0x1d   : > { %517 = vmatpush.bf16.msra.mxu0 %v889_v16 }
  0x1e   : > { %531 = vmatpush.bf16.msra.mxu1 %v897_v17 }
  0x1f   : > { %545 = vmatpush.bf16.msra.mxu2 %v905_v18 }
  0x20   : > { %559 = vmatpush.bf16.msra.mxu3 %v913_v19 }
  0x21   : > { %518 = vmatpush.bf16.msra.mxu0 %v888_v20 }
  0x22   : > { %532 = vmatpush.bf16.msra.mxu1 %v896_v21 }
  0x23   : > { %546 = vmatpush.bf16.msra.mxu2 %v904_v22 }
  0x24   : > { %560 = vmatpush.bf16.msra.mxu3 %v912_v23 }
  0x25   : > { %519 = vmatpush.bf16.msra.mxu0 %v887_v24 }
  0x26   : > { %533 = vmatpush.bf16.msra.mxu1 %v895_v25 }
  0x27   : > { %547 = vmatpush.bf16.msra.mxu2 %v903_v26 }
  0x28   : > { %561 = vmatpush.bf16.msra.mxu3 %v911_v27 }
  0x29   : > { %520 = vmatpush.bf16.msra.mxu0 %v886_v28 }
  0x2a   : > { %534 = vmatpush.bf16.msra.mxu1 %v894_v29 }
  0x2b   : > { %548 = vmatpush.bf16.msra.mxu2 %v902_v30 }
  0x2c   : > { %562 = vmatpush.bf16.msra.mxu3 %v910_v31  ;;  %521 = vmatmul.bf16.vlgmr.msra.gmra.mxu0 %v738_v40 }
  0x2d   : > { %535 = vmatmul.bf16.vlgmr.msra.gmra.mxu1 %v742_v41 }
  0x2e   : > { %549 = vmatmul.bf16.vlgmr.msra.gmra.mxu2 %v746_v42 }
  0x2f   : > { %563 = vmatmul.bf16.vlgmr.msra.gmra.mxu3 %v750_v43 }
  0xa9   : > { %v522_v44 = vpop.f32.mrf.mxu0 }
  0xaa   : > { %v536_v45 = vpop.f32.mrf.mxu1 }
  0xab   : > { %v537_v48 = vadd.f32 %v536_v45, %v522_v44 }
  0xb1   : > { %v550_v46 = vpop.f32.mrf.mxu2  ;;  %v524_v49 = vpop.f32.mrf.mxu0 }
  0xb2   : > { %v564_v47 = vpop.f32.mrf.mxu3  ;;  %v538_v50 = vpop.f32.mrf.mxu1  ;;  %v551_v51 = vadd.f32 %v550_v46, %v537_v48 }
  0xb3   : > { %v539_v52 = vadd.f32 %v538_v50, %v524_v49 }
  0xb4   : > { %v565_v54 = vadd.f32 %v564_v47, %v551_v51 }
  0xb6   : > { %v576_v58 = vmul.f32 %v565_v54, %v565_v54 }
  0xb9   : > { %v552_v53 = vpop.f32.mrf.mxu2 }
  0xba   : > { %v553_v55 = vadd.f32 %v552_v53, %v539_v52  ;;  %v566_v56 = vpop.f32.mrf.mxu3 }
  0xbc   : > { %v567_v57 = vadd.f32 %v566_v56, %v553_v55 }
  0xbe   : > { %v569_v59 = vadd.f32 %v567_v57, %v565_v54  ;;  %v577_v60 = vmul.f32 %v567_v57, %v567_v57  ;;  %v921_v61 = vpack.c.bf16 %v567_v57, %v565_v54 }
  0xc0   : > { %v570_v62 = vrot.slane %v569_v59, 4  ;;  %v578_v63 = vadd.f32 %v577_v60, %v576_v58  ;;  %922 = vst [vmem:[%s224_s21] sm:$0xff] %v921_v61  }
  0xc2   : > { %v571_v0 = vadd.f32 %v570_v62, %v569_v59  ;;  %v579_v1 = vrot.slane %v578_v63, 4 }
  0xc4   : > { %v572_v2 = vrot.slane %v571_v0, 2  ;;  %v580_v3 = vadd.f32 %v579_v1, %v578_v63 }
  0xc6   : > { %v573_v4 = vadd.f32 %v572_v2, %v571_v0  ;;  %v581_v5 = vrot.slane %v580_v3, 2 }
  0xc8   : > { %v574_v6 = vrot.slane %v573_v4, 1  ;;  %v582_v7 = vadd.f32 %v581_v5, %v580_v3 }
  0xca   : > { %v583_v8 = vrot.slane %v582_v7, 1  ;;  %v575_v9 = vadd.f32 %v574_v6, %v573_v4 }
  0xcc   : > { %v584_v10 = vadd.f32 %v583_v8, %v582_v7 }
  0xce   : > { %v586_v11 = vsel %vm585_vm0, %v575_v9, %v584_v10 }
  0xcf   : > { %587 = vst [vmem:[%s232_s24] sm:$0x3] %v586_v11 }
  0xd0 PF: > { %s14_s14 = sadd.s32 1, %s969_s14   ;;  %s1136_s12 = smov %s965_s13 }
  0xd1   : > { %p11_p6 = scmp.ge.s32.totalorder %s14_s14, 4   ;;  %s1137_s13 = smov %s1139_s15 }
  0xd3   :  { %13 = sbr.rel (!%p11_p6) target bundleno = 2 (0x2), region = 73 }

// kernel: _lambda_.12
= control target key start
LH: loop header
LB: loop body
LE: loop exit
PB: predicated region body
PF: predicated region fallthrough
CT: control target
= control target key end

     0   :  { %s122_s0 = inlined_call_operand.vmem [shape: bf16[32,128], index: 0, kind: input, shape index: {}]   ;;  %s123_s1 = inlined_call_operand.vmem [shape: f32[1,128], index: 1, kind: input, shape index: {}]   ;;  %s124_s2 = inlined_call_operand.vmem [shape: f32[1,128], index: 2, kind: input, shape index: {}]   ;;  %s125_s3 = inlined_call_operand.vmem [shape: bf16[32,128], index: 3, kind: output, shape index: {}]  }
   0x1   :  { %v63_v0 = vld [vmem:[%s122_s0] sm:$0xff]   ;;  %v80_v5 = vld [vmem:[%s122_s0 + $0x8] sm:$0xff]  }
   0x2   :  { %v82_v1 = vld [vmem:[%s123_s1] ss:$0 sm:$0xff]  ;;  %v64_v2 = vunpack.c.l.bf16 %v63_v0  ;;  %v65_v3 = vunpack.c.h.bf16 %v63_v0  ;;  %v68_v6 = vunpack.c.l.bf16 %v80_v5  ;;  %v69_v7 = vunpack.c.h.bf16 %v80_v5 }
   0x3   :  { %v83_v4 = vld [vmem:[%s124_s2] ss:$0 sm:$0xff] }
   0x4   :  { %v26_v8 = vmul.f32 %v82_v1, %v64_v2  ;;  %v27_v9 = vmul.f32 %v82_v1, %v65_v3  ;;  %v28_v10 = vmul.f32 %v82_v1, %v68_v6  ;;  %v29_v11 = vmul.f32 %v82_v1, %v69_v7 }
   0x6   :  { %v34_v12 = vadd.f32 %v83_v4, %v26_v8  ;;  %v35_v13 = vadd.f32 %v83_v4, %v27_v9  ;;  %v36_v14 = vadd.f32 %v83_v4, %v28_v10  ;;  %v37_v15 = vadd.f32 %v83_v4, %v29_v11 }
   0x8   :  { %vm38_vm0 = vcmp.ge.f32.partialorder %v34_v12, 0.0  ;;  %vm39_vm1 = vcmp.ge.f32.partialorder %v35_v13, 0.0  ;;  %v42_v16 = vmul.f32 0.2, %v34_v12  ;;  %v43_v17 = vmul.f32 0.2, %v35_v13 }
   0x9   :  { %vm40_vm2 = vcmp.ge.f32.partialorder %v36_v14, 0.0  ;;  %vm41_vm3 = vcmp.ge.f32.partialorder %v37_v15, 0.0  ;;  %v44_v18 = vmul.f32 0.2, %v36_v14  ;;  %v45_v19 = vmul.f32 0.2, %v37_v15 }
   0xa   :  { %v46_v20 = vsel %vm38_vm0, %v34_v12, %v42_v16  ;;  %v47_v21 = vsel %vm39_vm1, %v35_v13, %v43_v17 }
   0xb   :  { %v73_v22 = vpack.c.bf16 %v47_v21, %v46_v20  ;;  %v48_v23 = vsel %vm40_vm2, %v36_v14, %v44_v18  ;;  %v49_v24 = vsel %vm41_vm3, %v37_v15, %v45_v19 }
   0xc   :  { %v78_v25 = vpack.c.bf16 %v49_v24, %v48_v23 }
   0xd   :  { %74 = vst [vmem:[%s125_s3] sm:$0xff] %v73_v22  }
   0xe   :  { %81 = vst [vmem:[%s125_s3 + $0x8] sm:$0xff] %v78_v25  }

// kernel: _lambda_.14
= control target key start
LH: loop header
LB: loop body
LE: loop exit
PB: predicated region body
PF: predicated region fallthrough
CT: control target
= control target key end

     0   :  { %s259_s12 = smov 0   ;;  %s295_s0 = inlined_call_operand.vmem [shape: bf16[24,128], index: 0, kind: input, shape index: {}]   ;;  %s296_s1 = inlined_call_operand.vmem [shape: f32[1,128], index: 1, kind: input, shape index: {}]   ;;  %s297_s2 = inlined_call_operand.vmem [shape: f32[1,128], index: 2, kind: input, shape index: {}]   ;;  %s298_s3 = inlined_call_operand.vmem [shape: bf16[24,128], index: 3, kind: output, shape index: {}]  }
   0x1 LB: > { %s236_s13 = sadd.s32 4294967295, %s261_s12   ;;  %p240_p0 = scmp.ge.s32.totalorder %s261_s12, 1  ;;  %s261_s12 = sphi %s259_s12, %s13_s12  }
   0x2   : > { %p136_p1 = scmp.lt.s32.totalorder %s261_s12, 4 }
   0x4   : > { %p137_p2 = pnand %p240_p0, %p136_p1 }
   0x5   : > { %p158_p3 = scmp.lt.s32.totalorder (!%p137_p2), %s236_s13, 2 }
   0x6   : > { %140 = sbr.rel (%p137_p2) target bundleno = 27 (0x1b), region = 32 }
   0xb   : > { %s300_s13 = smov (!%p158_p3, %s236_s13), 2  ;;  %v253_v0 = vld [vmem:[%s296_s1] ss:$0 sm:$0xff] }
   0xc   : > { %s241_s14 = sshll.u32 %s300_s13, 2  ;;  %v254_v3 = vld [vmem:[%s297_s2] ss:$0 sm:$0xff] }
   0xd   : > { %s161_s17 = scalar_lea.vmem %s295_s0, %s241_s14  ;;  %s165_s24 = scalar_lea.vmem %s298_s3, %s241_s14 }
   0xe   : > { %v166_v1 = vld [vmem:[%s161_s17] sm:$0xf] }
   0xf   : > { %v167_v2 = vunpack.c.l.bf16 %v166_v1 }
  0x11   : > { %v172_v4 = vmul.f32 %v253_v0, %v167_v2 }
  0x13   : > { %v177_v5 = vadd.f32 %v254_v3, %v172_v4 }
  0x15   : > { %vm178_vm0 = vcmp.ge.f32.partialorder %v177_v5, 0.0  ;;  %v179_v6 = vmul.f32 0.2, %v177_v5 }
  0x17   : > { %v180_v7 = vsel %vm178_vm0, %v177_v5, %v179_v6 }
  0x18   : > { %v181_v8 = vpack.c.bf16 %v180_v7, %v180_v7 }
  0x1a   : > { %182 = vst [vmem:[%s165_s24] sm:$0xf] %v181_v8 }
  0x1b PF: > { %s13_s12 = sadd.s32 1, %s261_s12  }
  0x1c   : > { %p10_p4 = scmp.ge.s32.totalorder %s13_s12, 5  }
  0x1e   :  { %12 = sbr.rel (!%p10_p4) target bundleno = 1 (0x1), region = 62 }

// kernel: _lambda_.13
= control target key start
LH: loop header
LB: loop body
LE: loop exit
PB: predicated region body
PF: predicated region fallthrough
CT: control target
= control target key end

     0   :  { %vm768_vm0 = vcmask 1040384   ;;  %s1431_s1 = inlined_call_operand.vmem [shape: bf16[1024,128], index: 1, kind: input, shape index: {}]   ;;  %s1432_s0 = inlined_call_operand.vmem [shape: bf16[24,1024], index: 0, kind: input, shape index: {}]   ;;  %s1433_s2 = inlined_call_operand.vmem [shape: bf16[24,128], index: 2, kind: output, shape index: {0}]   ;;  %s1434_s3 = inlined_call_operand.vmem [shape: f32[1,2,128], index: 3, kind: output, shape index: {1}]  }
   0x1   :  { %v1088_v0 = vld [vmem:[%s1431_s1 + $0x38] sm:$0xff]  ;;  %v1087_v4 = vld [vmem:[%s1431_s1 + $0x30] sm:$0xff]  ;;  %v1086_v8 = vld [vmem:[%s1431_s1 + $0x28] sm:$0xff] }
   0x2   :  { %v1096_v1 = vld [vmem:[%s1431_s1 + $0x78] sm:$0xff]  ;;  %605 = vmatpush.bf16.msra.mxu0 %v1088_v0  ;;  %v1095_v5 = vld [vmem:[%s1431_s1 + $0x70] sm:$0xff]  ;;  %v1094_v9 = vld [vmem:[%s1431_s1 + $0x68] sm:$0xff] }
   0x3   :  { %v1104_v2 = vld [vmem:[%s1431_s1 + $0xb8] sm:$0xff]  ;;  %623 = vmatpush.bf16.msra.mxu1 %v1096_v1  ;;  %v1103_v6 = vld [vmem:[%s1431_s1 + $0xb0] sm:$0xff]  ;;  %v1102_v10 = vld [vmem:[%s1431_s1 + $0xa8] sm:$0xff] }
   0x4   :  { %v1112_v3 = vld [vmem:[%s1431_s1 + $0xf8] sm:$0xff]  ;;  %641 = vmatpush.bf16.msra.mxu2 %v1104_v2  ;;  %v1111_v7 = vld [vmem:[%s1431_s1 + $0xf0] sm:$0xff]  ;;  %v1110_v11 = vld [vmem:[%s1431_s1 + $0xe8] sm:$0xff] }
   0x5   :  { %659 = vmatpush.bf16.msra.mxu3 %v1112_v3  ;;  %v1085_v12 = vld [vmem:[%s1431_s1 + $0x20] sm:$0xff]  ;;  %v1084_v16 = vld [vmem:[%s1431_s1 + $0x18] sm:$0xff]  ;;  %v1083_v20 = vld [vmem:[%s1431_s1 + $0x10] sm:$0xff] }
   0x6   :  { %606 = vmatpush.bf16.msra.mxu0 %v1087_v4  ;;  %v1093_v13 = vld [vmem:[%s1431_s1 + $0x60] sm:$0xff]  ;;  %v1092_v17 = vld [vmem:[%s1431_s1 + $0x58] sm:$0xff]  ;;  %v1091_v21 = vld [vmem:[%s1431_s1 + $0x50] sm:$0xff] }
   0x7   :  { %624 = vmatpush.bf16.msra.mxu1 %v1095_v5  ;;  %v1101_v14 = vld [vmem:[%s1431_s1 + $0xa0] sm:$0xff]  ;;  %v1100_v18 = vld [vmem:[%s1431_s1 + $0x98] sm:$0xff]  ;;  %v1099_v22 = vld [vmem:[%s1431_s1 + $0x90] sm:$0xff] }
   0x8   :  { %642 = vmatpush.bf16.msra.mxu2 %v1103_v6  ;;  %v1109_v15 = vld [vmem:[%s1431_s1 + $0xe0] sm:$0xff]  ;;  %v1108_v19 = vld [vmem:[%s1431_s1 + $0xd8] sm:$0xff]  ;;  %v1107_v23 = vld [vmem:[%s1431_s1 + $0xd0] sm:$0xff] }
   0x9   :  { %660 = vmatpush.bf16.msra.mxu3 %v1111_v7  ;;  %v1082_v24 = vld [vmem:[%s1431_s1 + $0x8] sm:$0xff]  ;;  %v1081_v28 = vld [vmem:[%s1431_s1] sm:$0xff]  ;;  %v1136_v40 = vld [vmem:[%s1431_s1 + $0x1b8] sm:$0xff] }
   0xa   :  { %607 = vmatpush.bf16.msra.mxu0 %v1086_v8  ;;  %v1090_v25 = vld [vmem:[%s1431_s1 + $0x48] sm:$0xff]  ;;  %v1089_v29 = vld [vmem:[%s1431_s1 + $0x40] sm:$0xff]  ;;  %v1120_v41 = vld [vmem:[%s1431_s1 + $0x138] sm:$0xff] }
   0xb   :  { %625 = vmatpush.bf16.msra.mxu1 %v1094_v9  ;;  %v1098_v26 = vld [vmem:[%s1431_s1 + $0x88] sm:$0xff]  ;;  %v1097_v30 = vld [vmem:[%s1431_s1 + $0x80] sm:$0xff]  ;;  %v1128_v46 = vld [vmem:[%s1431_s1 + $0x178] sm:$0xff] }
   0xc   :  { %643 = vmatpush.bf16.msra.mxu2 %v1102_v10  ;;  %v1106_v27 = vld [vmem:[%s1431_s1 + $0xc8] sm:$0xff]  ;;  %v1105_v31 = vld [vmem:[%s1431_s1 + $0xc0] sm:$0xff]  ;;  %v1144_v47 = vld [vmem:[%s1431_s1 + $0x1f8] sm:$0xff] }
   0xd   :  { %661 = vmatpush.bf16.msra.mxu3 %v1110_v11  ;;  %v787_v32 = vld [vmem:[%s1432_s0] sm:$0xf]  ;;  %v1073_v34 = vld [vmem:[%s1432_s0 + $0x4] sm:$0xf]  ;;  %v795_v36 = vld [vmem:[%s1432_s0 + $0x8] sm:$0xf] }
   0xe   :  { %608 = vmatpush.bf16.msra.mxu0 %v1085_v12  ;;  %v1077_v33 = vld [vmem:[%s1432_s0 + $0x1c] sm:$0xf0]  ;;  %v789_v35 = vld [vmem:[%s1432_s0 + $0x20] sm:$0xf0]  ;;  %v1078_v37 = vld [vmem:[%s1432_s0 + $0x24] sm:$0xf0] }
   0xf   :  { %626 = vmatpush.bf16.msra.mxu1 %v1093_v13  ;;  %v1074_v38 = vld [vmem:[%s1432_s0 + $0xc] sm:$0xf]  ;;  %v788_v42 = vor.u32 %v1077_v33, %v787_v32  ;;  %v792_v43 = vor.u32 %v1073_v34, %v789_v35  ;;  %v796_v44 = vor.u32 %v1078_v37, %v795_v36  ;;  %v1135_v48 = vld [vmem:[%s1431_s1 + $0x1b0] sm:$0xff]  ;;  %v21_v54 = vld [vmem:[%s1432_s0 + $0x40] sm:$0xff] }
  0x10   :  { %644 = vmatpush.bf16.msra.mxu2 %v1101_v14  ;;  %v797_v39 = vld [vmem:[%s1432_s0 + $0x28] sm:$0xf0]  ;;  %v1119_v49 = vld [vmem:[%s1431_s1 + $0x130] sm:$0xff]  ;;  %v1133_v58 = vld [vmem:[%s1431_s1 + $0x1a0] sm:$0xff]  ;;  %v181_v60 = vunpack.c.l.b16 %v21_v54  ;;  %v182_v61 = vunpack.c.h.b16 %v21_v54 }
  0x11   :  { %662 = vmatpush.bf16.msra.mxu3 %v1109_v15  ;;  %v800_v45 = vor.u32 %v1074_v38, %v797_v39  ;;  %v1127_v50 = vld [vmem:[%s1431_s1 + $0x170] sm:$0xff]  ;;  %v1134_v52 = vld [vmem:[%s1431_s1 + $0x1a8] sm:$0xff]  ;;  %v1117_v59 = vld [vmem:[%s1431_s1 + $0x120] sm:$0xff] }
  0x12   :  { %609 = vmatpush.bf16.msra.mxu0 %v1084_v16  ;;  %v1143_v51 = vld [vmem:[%s1431_s1 + $0x1f0] sm:$0xff]  ;;  %v1118_v53 = vld [vmem:[%s1431_s1 + $0x128] sm:$0xff]  ;;  %v1125_v0 = vld [vmem:[%s1431_s1 + $0x160] sm:$0xff]  ;;  %v197_v4 = vpack.c.b16 %v181_v60, %v181_v60  ;;  %v198_v5 = vpack.c.b16 %v182_v61, %v182_v61 }
  0x13   :  { %627 = vmatpush.bf16.msra.mxu1 %v1092_v17  ;;  %v1126_v55 = vld [vmem:[%s1431_s1 + $0x168] sm:$0xff]  ;;  %v1141_v1 = vld [vmem:[%s1431_s1 + $0x1e0] sm:$0xff]  ;;  %v1132_v2 = vld [vmem:[%s1431_s1 + $0x198] sm:$0xff] }
  0x14   :  { %645 = vmatpush.bf16.msra.mxu2 %v1100_v18  ;;  %v1142_v56 = vld [vmem:[%s1431_s1 + $0x1e8] sm:$0xff]  ;;  %v1116_v3 = vld [vmem:[%s1431_s1 + $0x118] sm:$0xff]  ;;  %v1131_v10 = vld [vmem:[%s1431_s1 + $0x190] sm:$0xff] }
  0x15   :  { %663 = vmatpush.bf16.msra.mxu3 %v1108_v19  ;;  %v22_v57 = vld [vmem:[%s1432_s0 + $0x48] sm:$0xff]  ;;  %v1124_v8 = vld [vmem:[%s1431_s1 + $0x158] sm:$0xff]  ;;  %v1115_v11 = vld [vmem:[%s1431_s1 + $0x110] sm:$0xff] }
  0x16   :  { %610 = vmatpush.bf16.msra.mxu0 %v1083_v20  ;;  %v183_v62 = vunpack.c.l.b16 %v22_v57  ;;  %v184_v63 = vunpack.c.h.b16 %v22_v57  ;;  %v1140_v9 = vld [vmem:[%s1431_s1 + $0x1d8] sm:$0xff]  ;;  %v1123_v12 = vld [vmem:[%s1431_s1 + $0x150] sm:$0xff]  ;;  %v1130_v14 = vld [vmem:[%s1431_s1 + $0x188] sm:$0xff] }
  0x17   :  { %628 = vmatpush.bf16.msra.mxu1 %v1091_v21  ;;  %v1139_v13 = vld [vmem:[%s1431_s1 + $0x1d0] sm:$0xff]  ;;  %v1114_v15 = vld [vmem:[%s1431_s1 + $0x108] sm:$0xff]  ;;  %v1129_v18 = vld [vmem:[%s1431_s1 + $0x180] sm:$0xff] }
  0x18   :  { %646 = vmatpush.bf16.msra.mxu2 %v1099_v22  ;;  %v199_v6 = vpack.c.b16 %v183_v62, %v183_v62  ;;  %v200_v7 = vpack.c.b16 %v184_v63, %v184_v63  ;;  %v1122_v16 = vld [vmem:[%s1431_s1 + $0x148] sm:$0xff]  ;;  %v1113_v19 = vld [vmem:[%s1431_s1 + $0x100] sm:$0xff]  ;;  %v803_v22 = vld [vmem:[%s1432_s0 + $0x10] sm:$0xf] }
  0x19   :  { %664 = vmatpush.bf16.msra.mxu3 %v1107_v23  ;;  %v1138_v17 = vld [vmem:[%s1431_s1 + $0x1c8] sm:$0xff]  ;;  %v1121_v20 = vld [vmem:[%s1431_s1 + $0x140] sm:$0xff]  ;;  %v1079_v23 = vld [vmem:[%s1432_s0 + $0x2c] sm:$0xf0] }
  0x1a   :  { %611 = vmatpush.bf16.msra.mxu0 %v1082_v24  ;;  %v1137_v21 = vld [vmem:[%s1431_s1 + $0x1c0] sm:$0xff]  ;;  %v1075_v24 = vld [vmem:[%s1432_s0 + $0x14] sm:$0xf]  ;;  %v24_v35 = vld [vmem:[%s1432_s0 + $0x58] sm:$0xff] }
  0x1b   :  { %629 = vmatpush.bf16.msra.mxu1 %v1090_v25  ;;  %v805_v25 = vld [vmem:[%s1432_s0 + $0x30] sm:$0xf0]  ;;  %v187_v38 = vunpack.c.l.b16 %v24_v35  ;;  %v188_v39 = vunpack.c.h.b16 %v24_v35 }
  0x1c   :  { %647 = vmatpush.bf16.msra.mxu2 %v1098_v26  ;;  %v811_v26 = vld [vmem:[%s1432_s0 + $0x18] sm:$0xf]  ;;  %v23_v34 = vld [vmem:[%s1432_s0 + $0x50] sm:$0xff] }
  0x1d   :  { %665 = vmatpush.bf16.msra.mxu3 %v1106_v27  ;;  %v1080_v27 = vld [vmem:[%s1432_s0 + $0x34] sm:$0xf0]  ;;  %v185_v36 = vunpack.c.l.b16 %v23_v34  ;;  %v186_v37 = vunpack.c.h.b16 %v23_v34 }
  0x1e   :  { %612 = vmatpush.bf16.msra.mxu0 %v1081_v28  ;;  %v1076_v28 = vld [vmem:[%s1432_s0 + $0x1c] sm:$0xf]  ;;  %v812_v32 = vor.u32 %v1080_v27, %v811_v26 }
  0x1f   :  { %630 = vmatpush.bf16.msra.mxu1 %v1089_v29  ;;  %v813_v29 = vld [vmem:[%s1432_s0 + $0x38] sm:$0xf0] }
  0x20   :  { %648 = vmatpush.bf16.msra.mxu2 %v1097_v30  ;;  %v804_v30 = vor.u32 %v1079_v23, %v803_v22  ;;  %v816_v33 = vor.u32 %v1076_v28, %v813_v29 }
  0x21   :  { %666 = vmatpush.bf16.msra.mxu3 %v1105_v31  ;;  %613 = vmatmul.bf16.vlgmr.msra.gmra.mxu0 %v788_v42  ;;  %v808_v31 = vor.u32 %v1075_v24, %v805_v25  ;;  %v203_v42 = vpack.c.b16 %v187_v38, %v187_v38 }
  0x22   :  { %677 = vmatpush.bf16.msrb.mxu0 %v1120_v41  ;;  %631 = vmatmul.bf16.vlgmr.msra.gmra.mxu1 %v792_v43  ;;  %v202_v41 = vpack.c.b16 %v186_v37, %v186_v37  ;;  %v204_v43 = vpack.c.b16 %v188_v39, %v188_v39 }
  0x23   :  { %649 = vmatmul.bf16.vlgmr.msra.gmra.mxu2 %v796_v44  ;;  %695 = vmatpush.bf16.msrb.mxu1 %v1128_v46 }
  0x24   :  { %713 = vmatpush.bf16.msrb.mxu2 %v1136_v40  ;;  %667 = vmatmul.bf16.vlgmr.msra.gmra.mxu3 %v800_v45  ;;  %v201_v40 = vpack.c.b16 %v185_v36, %v185_v36 }
  0x25   :  { %731 = vmatpush.bf16.msrb.mxu3 %v1144_v47 }
  0x26   :  { %678 = vmatpush.bf16.msrb.mxu0 %v1119_v49 }
  0x27   :  { %696 = vmatpush.bf16.msrb.mxu1 %v1127_v50 }
  0x28   :  { %714 = vmatpush.bf16.msrb.mxu2 %v1135_v48 }
  0x29   :  { %732 = vmatpush.bf16.msrb.mxu3 %v1143_v51 }
  0x2a   :  { %679 = vmatpush.bf16.msrb.mxu0 %v1118_v53 }
  0x2b   :  { %697 = vmatpush.bf16.msrb.mxu1 %v1126_v55 }
  0x2c   :  { %715 = vmatpush.bf16.msrb.mxu2 %v1134_v52 }
  0x2d   :  { %733 = vmatpush.bf16.msrb.mxu3 %v1142_v56 }
  0x2e   :  { %680 = vmatpush.bf16.msrb.mxu0 %v1117_v59 }
  0x2f   :  { %698 = vmatpush.bf16.msrb.mxu1 %v1125_v0 }
  0x30   :  { %716 = vmatpush.bf16.msrb.mxu2 %v1133_v58 }
  0x31   :  { %734 = vmatpush.bf16.msrb.mxu3 %v1141_v1  ;;  %618 = vmatmul.bf16.gmra.mxu0 %v197_v4 }
  0x32   :  { %681 = vmatpush.bf16.msrb.mxu0 %v1116_v3  ;;  %636 = vmatmul.bf16.gmra.mxu1 %v198_v5 }
  0x33   :  { %654 = vmatmul.bf16.gmra.mxu2 %v199_v6  ;;  %699 = vmatpush.bf16.msrb.mxu1 %v1124_v8 }
  0x34   :  { %717 = vmatpush.bf16.msrb.mxu2 %v1132_v2  ;;  %672 = vmatmul.bf16.gmra.mxu3 %v200_v7 }
  0x35   :  { %735 = vmatpush.bf16.msrb.mxu3 %v1140_v9 }
  0x36   :  { %682 = vmatpush.bf16.msrb.mxu0 %v1115_v11 }
  0x37   :  { %700 = vmatpush.bf16.msrb.mxu1 %v1123_v12 }
  0x38   :  { %718 = vmatpush.bf16.msrb.mxu2 %v1131_v10 }
  0x39   :  { %736 = vmatpush.bf16.msrb.mxu3 %v1139_v13 }
  0x3a   :  { %683 = vmatpush.bf16.msrb.mxu0 %v1114_v15 }
  0x3b   :  { %701 = vmatpush.bf16.msrb.mxu1 %v1122_v16 }
  0x3c   :  { %719 = vmatpush.bf16.msrb.mxu2 %v1130_v14 }
  0x3d   :  { %737 = vmatpush.bf16.msrb.mxu3 %v1138_v17 }
  0x3e   :  { %684 = vmatpush.bf16.msrb.mxu0 %v1113_v19 }
  0x3f   :  { %702 = vmatpush.bf16.msrb.mxu1 %v1121_v20 }
  0x40   :  { %720 = vmatpush.bf16.msrb.mxu2 %v1129_v18 }
  0x41   :  { %738 = vmatpush.bf16.msrb.mxu3 %v1137_v21  ;;  %685 = vmatmul.bf16.vlgmr.msrb.gmra.mxu0 %v804_v30 }
  0x42   :  { %703 = vmatmul.bf16.vlgmr.msrb.gmra.mxu1 %v808_v31 }
  0x43   :  { %721 = vmatmul.bf16.vlgmr.msrb.gmra.mxu2 %v812_v32 }
  0x44   :  { %739 = vmatmul.bf16.vlgmr.msrb.gmra.mxu3 %v816_v33 }
  0x51   :  { %690 = vmatmul.bf16.gmra.mxu0 %v201_v40 }
  0x52   :  { %708 = vmatmul.bf16.gmra.mxu1 %v202_v41 }
  0x53   :  { %726 = vmatmul.bf16.gmra.mxu2 %v203_v42 }
  0x54   :  { %744 = vmatmul.bf16.gmra.mxu3 %v204_v43 }
  0x9e   :  { %v614_v44 = vpop.f32.mrf.mxu0 }
  0x9f   :  { %v632_v45 = vpop.f32.mrf.mxu1 }
  0xa0   :  { %v633_v60 = vadd.f32 %v632_v45, %v614_v44 }
  0xa6   :  { %v650_v46 = vpop.f32.mrf.mxu2  ;;  %v616_v48 = vpop.f32.mrf.mxu0 }
  0xa7   :  { %v668_v47 = vpop.f32.mrf.mxu3  ;;  %v634_v49 = vpop.f32.mrf.mxu1  ;;  %v651_v63 = vadd.f32 %v650_v46, %v633_v60 }
  0xa8   :  { %v635_v0 = vadd.f32 %v634_v49, %v616_v48 }
  0xa9   :  { %v669_v2 = vadd.f32 %v668_v47, %v651_v63 }
  0xae   :  { %v652_v50 = vpop.f32.mrf.mxu2  ;;  %v619_v52 = vpop.f32.mrf.mxu0 }
  0xaf   :  { %v670_v51 = vpop.f32.mrf.mxu3  ;;  %v637_v53 = vpop.f32.mrf.mxu1  ;;  %v653_v1 = vadd.f32 %v652_v50, %v635_v0 }
  0xb0   :  { %v638_v9 = vadd.f32 %v637_v53, %v619_v52 }
  0xb1   :  { %v671_v4 = vadd.f32 %v670_v51, %v653_v1 }
  0xb6   :  { %v655_v54 = vpop.f32.mrf.mxu2  ;;  %v621_v56 = vpop.f32.mrf.mxu0 }
  0xb7   :  { %v673_v55 = vpop.f32.mrf.mxu3  ;;  %v639_v57 = vpop.f32.mrf.mxu1  ;;  %v656_v11 = vadd.f32 %v655_v54, %v638_v9 }
  0xb9   :  { %v674_v16 = vadd.f32 %v673_v55, %v656_v11 }
  0xbe   :  { %v657_v58 = vpop.f32.mrf.mxu2  ;;  %v686_v61 = vpop.f32.mrf.mxu0 }
  0xbf   :  { %v675_v59 = vpop.f32.mrf.mxu3  ;;  %v704_v62 = vpop.f32.mrf.mxu1  ;;  %v687_v5 = vadd.f32 %v686_v61, %v669_v2 }
  0xc1   :  { %v705_v12 = vadd.f32 %v704_v62, %v687_v5 }
  0xc6   :  { %v722_v3 = vpop.f32.mrf.mxu2  ;;  %v688_v7 = vpop.f32.mrf.mxu0 }
  0xc7   :  { %v740_v6 = vpop.f32.mrf.mxu3  ;;  %v706_v8 = vpop.f32.mrf.mxu1  ;;  %v689_v10 = vadd.f32 %v688_v7, %v671_v4  ;;  %v723_v13 = vadd.f32 %v722_v3, %v705_v12 }
  0xc9   :  { %v707_v14 = vadd.f32 %v706_v8, %v689_v10  ;;  %v741_v21 = vadd.f32 %v740_v6, %v723_v13 }
  0xcb   :  { %v757_v32 = vmul.f32 %v741_v21, %v741_v21 }
  0xce   :  { %v724_v15 = vpop.f32.mrf.mxu2  ;;  %v691_v19 = vpop.f32.mrf.mxu0 }
  0xcf   :  { %v725_v17 = vadd.f32 %v724_v15, %v707_v14  ;;  %v742_v18 = vpop.f32.mrf.mxu3  ;;  %v709_v20 = vpop.f32.mrf.mxu1  ;;  %v692_v23 = vadd.f32 %v691_v19, %v674_v16 }
  0xd1   :  { %v743_v22 = vadd.f32 %v742_v18, %v725_v17  ;;  %v710_v25 = vadd.f32 %v709_v20, %v692_v23 }
  0xd3   :  { %v1148_v24 = vpack.c.bf16 %v743_v22, %v741_v21  ;;  %v758_v27 = vmul.f32 %v743_v22, %v743_v22  ;;  %v749_v33 = vadd.f32 %v743_v22, %v741_v21 }
  0xd5   :  { %1149 = vst [vmem:[%s1433_s2] sm:$0xff] %v1148_v24   ;;  %v760_v35 = vadd.f32 %v758_v27, %v757_v32 }
  0xd6   :  { %v727_v26 = vpop.f32.mrf.mxu2  ;;  %v693_v30 = vpop.f32.mrf.mxu0 }
  0xd7   :  { %v728_v28 = vadd.f32 %v727_v26, %v710_v25  ;;  %v745_v29 = vpop.f32.mrf.mxu3  ;;  %v711_v31 = vpop.f32.mrf.mxu1 }
  0xd9   :  { %v746_v34 = vadd.f32 %v745_v29, %v728_v28 }
  0xdb   :  { %v750_v36 = vadd.f32 %v749_v33, %v746_v34  ;;  %v759_v37 = vmul.f32 %v746_v34, %v746_v34  ;;  %v773_v38 = vpack.c.bf16 %v746_v34, %v746_v34 }
  0xdd   :  { %v751_v39 = vrot.slane %v750_v36, 4  ;;  %v761_v40 = vadd.f32 %v760_v35, %v759_v37  ;;  %776 = vst [vmem:[%s1433_s2 + $0x8] sm:$0xf] %v773_v38 }
  0xde   :  { %v729_v41 = vpop.f32.mrf.mxu2 }
  0xdf   :  { %v752_v42 = vadd.f32 %v751_v39, %v750_v36  ;;  %v762_v43 = vrot.slane %v761_v40, 4  ;;  %v747_v44 = vpop.f32.mrf.mxu3 }
  0xe1   :  { %v753_v45 = vrot.slane %v752_v42, 2  ;;  %v763_v46 = vadd.f32 %v762_v43, %v761_v40 }
  0xe3   :  { %v754_v47 = vadd.f32 %v753_v45, %v752_v42  ;;  %v764_v48 = vrot.slane %v763_v46, 2 }
  0xe5   :  { %v755_v49 = vrot.slane %v754_v47, 1  ;;  %v765_v50 = vadd.f32 %v764_v48, %v763_v46 }
  0xe7   :  { %v766_v51 = vrot.slane %v765_v50, 1  ;;  %v756_v52 = vadd.f32 %v755_v49, %v754_v47 }
  0xe9   :  { %v767_v53 = vadd.f32 %v766_v51, %v765_v50 }
  0xeb   :  { %v769_v54 = vsel %vm768_vm0, %v756_v52, %v767_v53 }
  0xec   :  { %770 = vst [vmem:[%s1434_s3] sm:$0x3] %v769_v54 }

// kernel: _lambda_.15
= control target key start
LH: loop header
LB: loop body
LE: loop exit
PB: predicated region body
PF: predicated region fallthrough
CT: control target
= control target key end

     0   :  { %s2394_s1 = inlined_call_operand.vmem [shape: bf16[2048,128], index: 1, kind: input, shape index: {}]   ;;  %s2395_s2 = inlined_call_operand.vmem [shape: f32[1,128], index: 2, kind: input, shape index: {}]   ;;  %s2396_s0 = inlined_call_operand.vmem [shape: bf16[8,2048], index: 0, kind: input, shape index: {}]   ;;  %s2397_s3 = inlined_call_operand.vmem [shape: f32[8,128], index: 3, kind: output, shape index: {}]  }
   0x1   :  { %v1838_v0 = vld [vmem:[%s2394_s1 + $0x38] sm:$0xff]  ;;  %v1837_v4 = vld [vmem:[%s2394_s1 + $0x30] sm:$0xff]  ;;  %v1836_v8 = vld [vmem:[%s2394_s1 + $0x28] sm:$0xff] }
   0x2   :  { %v1846_v1 = vld [vmem:[%s2394_s1 + $0x78] sm:$0xff]  ;;  %1106 = vmatpush.bf16.msra.mxu0 %v1838_v0  ;;  %v1845_v5 = vld [vmem:[%s2394_s1 + $0x70] sm:$0xff]  ;;  %v1844_v9 = vld [vmem:[%s2394_s1 + $0x68] sm:$0xff] }
   0x3   :  { %v1854_v2 = vld [vmem:[%s2394_s1 + $0xb8] sm:$0xff]  ;;  %1119 = vmatpush.bf16.msra.mxu1 %v1846_v1  ;;  %v1853_v6 = vld [vmem:[%s2394_s1 + $0xb0] sm:$0xff]  ;;  %v1852_v10 = vld [vmem:[%s2394_s1 + $0xa8] sm:$0xff] }
   0x4   :  { %v1862_v3 = vld [vmem:[%s2394_s1 + $0xf8] sm:$0xff]  ;;  %1132 = vmatpush.bf16.msra.mxu2 %v1854_v2  ;;  %v1861_v7 = vld [vmem:[%s2394_s1 + $0xf0] sm:$0xff]  ;;  %v1860_v11 = vld [vmem:[%s2394_s1 + $0xe8] sm:$0xff] }
   0x5   :  { %1145 = vmatpush.bf16.msra.mxu3 %v1862_v3  ;;  %v1835_v12 = vld [vmem:[%s2394_s1 + $0x20] sm:$0xff]  ;;  %v1834_v16 = vld [vmem:[%s2394_s1 + $0x18] sm:$0xff]  ;;  %v1833_v20 = vld [vmem:[%s2394_s1 + $0x10] sm:$0xff] }
   0x6   :  { %1107 = vmatpush.bf16.msra.mxu0 %v1837_v4  ;;  %v1843_v13 = vld [vmem:[%s2394_s1 + $0x60] sm:$0xff]  ;;  %v1842_v17 = vld [vmem:[%s2394_s1 + $0x58] sm:$0xff]  ;;  %v1841_v21 = vld [vmem:[%s2394_s1 + $0x50] sm:$0xff] }
   0x7   :  { %1120 = vmatpush.bf16.msra.mxu1 %v1845_v5  ;;  %v1851_v14 = vld [vmem:[%s2394_s1 + $0xa0] sm:$0xff]  ;;  %v1850_v18 = vld [vmem:[%s2394_s1 + $0x98] sm:$0xff]  ;;  %v1849_v22 = vld [vmem:[%s2394_s1 + $0x90] sm:$0xff] }
   0x8   :  { %1133 = vmatpush.bf16.msra.mxu2 %v1853_v6  ;;  %v1859_v15 = vld [vmem:[%s2394_s1 + $0xe0] sm:$0xff]  ;;  %v1858_v19 = vld [vmem:[%s2394_s1 + $0xd8] sm:$0xff]  ;;  %v1857_v23 = vld [vmem:[%s2394_s1 + $0xd0] sm:$0xff] }
   0x9   :  { %1146 = vmatpush.bf16.msra.mxu3 %v1861_v7  ;;  %v1832_v24 = vld [vmem:[%s2394_s1 + $0x8] sm:$0xff]  ;;  %v14_v29 = vld [vmem:[%s2396_s0] sm:$0xff]  ;;  %v1870_v38 = vld [vmem:[%s2394_s1 + $0x138] sm:$0xff] }
   0xa   :  { %1108 = vmatpush.bf16.msra.mxu0 %v1836_v8  ;;  %v1840_v25 = vld [vmem:[%s2394_s1 + $0x48] sm:$0xff]  ;;  %v1831_v30 = vld [vmem:[%s2394_s1] sm:$0xff]  ;;  %v290_v33 = vunpack.c.l.b16 %v14_v29  ;;  %v291_v37 = vunpack.c.h.b16 %v14_v29  ;;  %v1878_v39 = vld [vmem:[%s2394_s1 + $0x178] sm:$0xff] }
   0xb   :  { %1121 = vmatpush.bf16.msra.mxu1 %v1844_v9  ;;  %v1848_v26 = vld [vmem:[%s2394_s1 + $0x88] sm:$0xff]  ;;  %v1839_v31 = vld [vmem:[%s2394_s1 + $0x40] sm:$0xff]  ;;  %v1886_v40 = vld [vmem:[%s2394_s1 + $0x1b8] sm:$0xff] }
   0xc   :  { %1134 = vmatpush.bf16.msra.mxu2 %v1852_v10  ;;  %v1856_v27 = vld [vmem:[%s2394_s1 + $0xc8] sm:$0xff]  ;;  %v1847_v34 = vld [vmem:[%s2394_s1 + $0x80] sm:$0xff]  ;;  %v1894_v41 = vld [vmem:[%s2394_s1 + $0x1f8] sm:$0xff]  ;;  %v306_v43 = vpack.c.b16 %v290_v33, %v290_v33  ;;  %v307_v45 = vpack.c.b16 %v291_v37, %v291_v37 }
   0xd   :  { %1147 = vmatpush.bf16.msra.mxu3 %v1860_v11  ;;  %v15_v28 = vld [vmem:[%s2396_s0 + $0x8] sm:$0xff]  ;;  %v1855_v35 = vld [vmem:[%s2394_s1 + $0xc0] sm:$0xff]  ;;  %v1869_v46 = vld [vmem:[%s2394_s1 + $0x130] sm:$0xff] }
   0xe   :  { %1109 = vmatpush.bf16.msra.mxu0 %v1835_v12  ;;  %v292_v32 = vunpack.c.l.b16 %v15_v28  ;;  %v293_v36 = vunpack.c.h.b16 %v15_v28  ;;  %v1877_v47 = vld [vmem:[%s2394_s1 + $0x170] sm:$0xff]  ;;  %v1868_v50 = vld [vmem:[%s2394_s1 + $0x128] sm:$0xff]  ;;  %v1867_v54 = vld [vmem:[%s2394_s1 + $0x120] sm:$0xff] }
   0xf   :  { %1122 = vmatpush.bf16.msra.mxu1 %v1843_v13  ;;  %v1885_v48 = vld [vmem:[%s2394_s1 + $0x1b0] sm:$0xff]  ;;  %v1876_v51 = vld [vmem:[%s2394_s1 + $0x168] sm:$0xff]  ;;  %v1875_v55 = vld [vmem:[%s2394_s1 + $0x160] sm:$0xff] }
  0x10   :  { %1135 = vmatpush.bf16.msra.mxu2 %v1851_v14  ;;  %v308_v42 = vpack.c.b16 %v292_v32, %v292_v32  ;;  %v309_v44 = vpack.c.b16 %v293_v36, %v293_v36  ;;  %v1893_v49 = vld [vmem:[%s2394_s1 + $0x1f0] sm:$0xff]  ;;  %v1884_v52 = vld [vmem:[%s2394_s1 + $0x1a8] sm:$0xff]  ;;  %v1883_v56 = vld [vmem:[%s2394_s1 + $0x1a0] sm:$0xff] }
  0x11   :  { %1148 = vmatpush.bf16.msra.mxu3 %v1859_v15  ;;  %v1892_v53 = vld [vmem:[%s2394_s1 + $0x1e8] sm:$0xff]  ;;  %v1891_v57 = vld [vmem:[%s2394_s1 + $0x1e0] sm:$0xff]  ;;  %v1866_v58 = vld [vmem:[%s2394_s1 + $0x118] sm:$0xff] }
  0x12   :  { %1110 = vmatpush.bf16.msra.mxu0 %v1834_v16  ;;  %v1874_v59 = vld [vmem:[%s2394_s1 + $0x158] sm:$0xff]  ;;  %v1865_v62 = vld [vmem:[%s2394_s1 + $0x110] sm:$0xff]  ;;  %v1864_v2 = vld [vmem:[%s2394_s1 + $0x108] sm:$0xff] }
  0x13   :  { %1123 = vmatpush.bf16.msra.mxu1 %v1842_v17  ;;  %v1882_v60 = vld [vmem:[%s2394_s1 + $0x198] sm:$0xff]  ;;  %v1873_v63 = vld [vmem:[%s2394_s1 + $0x150] sm:$0xff]  ;;  %v1872_v3 = vld [vmem:[%s2394_s1 + $0x148] sm:$0xff] }
  0x14   :  { %1136 = vmatpush.bf16.msra.mxu2 %v1850_v18  ;;  %v1890_v61 = vld [vmem:[%s2394_s1 + $0x1d8] sm:$0xff]  ;;  %v1881_v0 = vld [vmem:[%s2394_s1 + $0x190] sm:$0xff]  ;;  %v1880_v4 = vld [vmem:[%s2394_s1 + $0x188] sm:$0xff] }
  0x15   :  { %1149 = vmatpush.bf16.msra.mxu3 %v1858_v19  ;;  %v1889_v1 = vld [vmem:[%s2394_s1 + $0x1d0] sm:$0xff]  ;;  %v1888_v5 = vld [vmem:[%s2394_s1 + $0x1c8] sm:$0xff]  ;;  %v17_v6 = vld [vmem:[%s2396_s0 + $0x18] sm:$0xff] }
  0x16   :  { %1111 = vmatpush.bf16.msra.mxu0 %v1833_v20  ;;  %v16_v7 = vld [vmem:[%s2396_s0 + $0x10] sm:$0xff]  ;;  %v1863_v8 = vld [vmem:[%s2394_s1 + $0x100] sm:$0xff]  ;;  %v296_v10 = vunpack.c.l.b16 %v17_v6  ;;  %v297_v14 = vunpack.c.h.b16 %v17_v6  ;;  %v1902_v16 = vld [vmem:[%s2394_s1 + $0x238] sm:$0xff] }
  0x17   :  { %1124 = vmatpush.bf16.msra.mxu1 %v1841_v21  ;;  %v1871_v9 = vld [vmem:[%s2394_s1 + $0x140] sm:$0xff]  ;;  %v294_v11 = vunpack.c.l.b16 %v16_v7  ;;  %v295_v15 = vunpack.c.h.b16 %v16_v7  ;;  %v1910_v17 = vld [vmem:[%s2394_s1 + $0x278] sm:$0xff]  ;;  %v1900_v28 = vld [vmem:[%s2394_s1 + $0x228] sm:$0xff] }
  0x18   :  { %1137 = vmatpush.bf16.msra.mxu2 %v1849_v22  ;;  %v1879_v12 = vld [vmem:[%s2394_s1 + $0x180] sm:$0xff]  ;;  %v1918_v18 = vld [vmem:[%s2394_s1 + $0x2b8] sm:$0xff]  ;;  %v312_v20 = vpack.c.b16 %v296_v10, %v296_v10  ;;  %v313_v22 = vpack.c.b16 %v297_v14, %v297_v14  ;;  %v1908_v29 = vld [vmem:[%s2394_s1 + $0x268] sm:$0xff] }
  0x19   :  { %1150 = vmatpush.bf16.msra.mxu3 %v1857_v23  ;;  %v1887_v13 = vld [vmem:[%s2394_s1 + $0x1c0] sm:$0xff]  ;;  %v1926_v19 = vld [vmem:[%s2394_s1 + $0x2f8] sm:$0xff]  ;;  %v310_v21 = vpack.c.b16 %v294_v11, %v294_v11  ;;  %v311_v23 = vpack.c.b16 %v295_v15, %v295_v15  ;;  %v1932_v6 = vld [vmem:[%s2394_s1 + $0x328] sm:$0xff] }
  0x1a   :  { %1112 = vmatpush.bf16.msra.mxu0 %v1832_v24  ;;  %v1901_v24 = vld [vmem:[%s2394_s1 + $0x230] sm:$0xff]  ;;  %v1899_v32 = vld [vmem:[%s2394_s1 + $0x220] sm:$0xff]  ;;  %v1898_v36 = vld [vmem:[%s2394_s1 + $0x218] sm:$0xff] }
  0x1b   :  { %1125 = vmatpush.bf16.msra.mxu1 %v1840_v25  ;;  %v1909_v25 = vld [vmem:[%s2394_s1 + $0x270] sm:$0xff]  ;;  %v1907_v33 = vld [vmem:[%s2394_s1 + $0x260] sm:$0xff]  ;;  %v1906_v37 = vld [vmem:[%s2394_s1 + $0x258] sm:$0xff] }
  0x1c   :  { %1138 = vmatpush.bf16.msra.mxu2 %v1848_v26  ;;  %v1917_v26 = vld [vmem:[%s2394_s1 + $0x2b0] sm:$0xff]  ;;  %v1940_v7 = vld [vmem:[%s2394_s1 + $0x368] sm:$0xff]  ;;  %v1931_v10 = vld [vmem:[%s2394_s1 + $0x320] sm:$0xff] }
  0x1d   :  { %1151 = vmatpush.bf16.msra.mxu3 %v1856_v27  ;;  %v1925_v27 = vld [vmem:[%s2394_s1 + $0x2f0] sm:$0xff]  ;;  %v1939_v11 = vld [vmem:[%s2394_s1 + $0x360] sm:$0xff]  ;;  %v1930_v14 = vld [vmem:[%s2394_s1 + $0x318] sm:$0xff] }
  0x1e   :  { %1113 = vmatpush.bf16.msra.mxu0 %v1831_v30  ;;  %v1916_v30 = vld [vmem:[%s2394_s1 + $0x2a8] sm:$0xff]  ;;  %v1938_v15 = vld [vmem:[%s2394_s1 + $0x358] sm:$0xff] }
  0x1f   :  { %1126 = vmatpush.bf16.msra.mxu1 %v1839_v31  ;;  %v1924_v31 = vld [vmem:[%s2394_s1 + $0x2e8] sm:$0xff] }
  0x20   :  { %1139 = vmatpush.bf16.msra.mxu2 %v1847_v34  ;;  %v1915_v34 = vld [vmem:[%s2394_s1 + $0x2a0] sm:$0xff] }
  0x21   :  { %1152 = vmatpush.bf16.msra.mxu3 %v1855_v35  ;;  %1114 = vmatmul.bf16.vlgmr.msra.gmra.mxu0 %v306_v43  ;;  %v1923_v35 = vld [vmem:[%s2394_s1 + $0x2e0] sm:$0xff]  ;;  %v1921_v43 = vld [vmem:[%s2394_s1 + $0x2d0] sm:$0xff] }
  0x22   :  { %1158 = vmatpush.bf16.msrb.mxu0 %v1870_v38  ;;  %1127 = vmatmul.bf16.vlgmr.msra.gmra.mxu1 %v307_v45  ;;  %v1914_v38 = vld [vmem:[%s2394_s1 + $0x298] sm:$0xff]  ;;  %v1904_v45 = vld [vmem:[%s2394_s1 + $0x248] sm:$0xff] }
  0x23   :  { %1171 = vmatpush.bf16.msrb.mxu1 %v1878_v39  ;;  %1140 = vmatmul.bf16.vlgmr.msra.gmra.mxu2 %v308_v42  ;;  %v1922_v39 = vld [vmem:[%s2394_s1 + $0x2d8] sm:$0xff]  ;;  %v1913_v42 = vld [vmem:[%s2394_s1 + $0x290] sm:$0xff] }
  0x24   :  { %1184 = vmatpush.bf16.msrb.mxu2 %v1886_v40  ;;  %1153 = vmatmul.bf16.vlgmr.msra.gmra.mxu3 %v309_v44  ;;  %v1897_v40 = vld [vmem:[%s2394_s1 + $0x210] sm:$0xff]  ;;  %v1896_v44 = vld [vmem:[%s2394_s1 + $0x208] sm:$0xff] }
  0x25   :  { %1197 = vmatpush.bf16.msrb.mxu3 %v1894_v41  ;;  %v1905_v41 = vld [vmem:[%s2394_s1 + $0x250] sm:$0xff] }
  0x26   :  { %1159 = vmatpush.bf16.msrb.mxu0 %v1869_v46  ;;  %v1912_v46 = vld [vmem:[%s2394_s1 + $0x288] sm:$0xff] }
  0x27   :  { %1172 = vmatpush.bf16.msrb.mxu1 %v1877_v47  ;;  %v1920_v47 = vld [vmem:[%s2394_s1 + $0x2c8] sm:$0xff] }
  0x28   :  { %1185 = vmatpush.bf16.msrb.mxu2 %v1885_v48  ;;  %v18_v48 = vld [vmem:[%s2396_s0 + $0x20] sm:$0xff] }
  0x29   :  { %1198 = vmatpush.bf16.msrb.mxu3 %v1893_v49  ;;  %v19_v49 = vld [vmem:[%s2396_s0 + $0x28] sm:$0xff] }
  0x2a   :  { %1160 = vmatpush.bf16.msrb.mxu0 %v1868_v50  ;;  %v1895_v50 = vld [vmem:[%s2394_s1 + $0x200] sm:$0xff] }
  0x2b   :  { %1173 = vmatpush.bf16.msrb.mxu1 %v1876_v51  ;;  %v1903_v51 = vld [vmem:[%s2394_s1 + $0x240] sm:$0xff] }
  0x2c   :  { %1186 = vmatpush.bf16.msrb.mxu2 %v1884_v52  ;;  %v298_v52 = vunpack.c.l.b16 %v18_v48 }
  0x2d   :  { %1199 = vmatpush.bf16.msrb.mxu3 %v1892_v53  ;;  %v300_v53 = vunpack.c.l.b16 %v19_v49 }
  0x2e   :  { %1161 = vmatpush.bf16.msrb.mxu0 %v1867_v54  ;;  %v1911_v54 = vld [vmem:[%s2394_s1 + $0x280] sm:$0xff] }
  0x2f   :  { %1174 = vmatpush.bf16.msrb.mxu1 %v1875_v55  ;;  %v1919_v55 = vld [vmem:[%s2394_s1 + $0x2c0] sm:$0xff] }
  0x30   :  { %1187 = vmatpush.bf16.msrb.mxu2 %v1883_v56  ;;  %v299_v56 = vunpack.c.h.b16 %v18_v48 }
  0x31   :  { %1200 = vmatpush.bf16.msrb.mxu3 %v1891_v57  ;;  %v301_v57 = vunpack.c.h.b16 %v19_v49 }
  0x32   :  { %1162 = vmatpush.bf16.msrb.mxu0 %v1866_v58  ;;  %v1934_v58 = vld [vmem:[%s2394_s1 + $0x338] sm:$0xff] }
  0x33   :  { %1175 = vmatpush.bf16.msrb.mxu1 %v1874_v59  ;;  %v1942_v59 = vld [vmem:[%s2394_s1 + $0x378] sm:$0xff] }
  0x34   :  { %1188 = vmatpush.bf16.msrb.mxu2 %v1882_v60  ;;  %v1950_v60 = vld [vmem:[%s2394_s1 + $0x3b8] sm:$0xff] }
  0x35   :  { %1201 = vmatpush.bf16.msrb.mxu3 %v1890_v61  ;;  %v1958_v61 = vld [vmem:[%s2394_s1 + $0x3f8] sm:$0xff] }
  0x36   :  { %1163 = vmatpush.bf16.msrb.mxu0 %v1865_v62  ;;  %v314_v62 = vpack.c.b16 %v298_v52, %v298_v52 }
  0x37   :  { %1176 = vmatpush.bf16.msrb.mxu1 %v1873_v63  ;;  %v316_v63 = vpack.c.b16 %v300_v53, %v300_v53 }
  0x38   :  { %1189 = vmatpush.bf16.msrb.mxu2 %v1881_v0  ;;  %v315_v0 = vpack.c.b16 %v299_v56, %v299_v56 }
  0x39   :  { %1202 = vmatpush.bf16.msrb.mxu3 %v1889_v1  ;;  %v317_v1 = vpack.c.b16 %v301_v57, %v301_v57 }
  0x3a   :  { %1164 = vmatpush.bf16.msrb.mxu0 %v1864_v2  ;;  %v1933_v2 = vld [vmem:[%s2394_s1 + $0x330] sm:$0xff] }
  0x3b   :  { %1177 = vmatpush.bf16.msrb.mxu1 %v1872_v3  ;;  %v1941_v3 = vld [vmem:[%s2394_s1 + $0x370] sm:$0xff] }
  0x3c   :  { %1190 = vmatpush.bf16.msrb.mxu2 %v1880_v4  ;;  %v1949_v4 = vld [vmem:[%s2394_s1 + $0x3b0] sm:$0xff] }
  0x3d   :  { %1203 = vmatpush.bf16.msrb.mxu3 %v1888_v5  ;;  %v1957_v5 = vld [vmem:[%s2394_s1 + $0x3f0] sm:$0xff] }
  0x3e   :  { %1165 = vmatpush.bf16.msrb.mxu0 %v1863_v8  ;;  %v1948_v8 = vld [vmem:[%s2394_s1 + $0x3a8] sm:$0xff] }
  0x3f   :  { %1178 = vmatpush.bf16.msrb.mxu1 %v1871_v9  ;;  %v1956_v9 = vld [vmem:[%s2394_s1 + $0x3e8] sm:$0xff] }
  0x40   :  { %1191 = vmatpush.bf16.msrb.mxu2 %v1879_v12  ;;  %v1947_v12 = vld [vmem:[%s2394_s1 + $0x3a0] sm:$0xff] }
  0x41   :  { %1204 = vmatpush.bf16.msrb.mxu3 %v1887_v13  ;;  %1166 = vmatmul.bf16.vlgmr.msrb.gmra.mxu0 %v310_v21  ;;  %v1955_v13 = vld [vmem:[%s2394_s1 + $0x3e0] sm:$0xff]  ;;  %v1953_v21 = vld [vmem:[%s2394_s1 + $0x3d0] sm:$0xff] }
  0x42   :  { %1210 = vmatpush.bf16.msra.mxu0 %v1902_v16  ;;  %1179 = vmatmul.bf16.vlgmr.msrb.gmra.mxu1 %v311_v23  ;;  %v1946_v16 = vld [vmem:[%s2394_s1 + $0x398] sm:$0xff]  ;;  %v1936_v23 = vld [vmem:[%s2394_s1 + $0x348] sm:$0xff] }
  0x43   :  { %1223 = vmatpush.bf16.msra.mxu1 %v1910_v17  ;;  %1192 = vmatmul.bf16.vlgmr.msrb.gmra.mxu2 %v312_v20  ;;  %v1954_v17 = vld [vmem:[%s2394_s1 + $0x3d8] sm:$0xff]  ;;  %v1945_v20 = vld [vmem:[%s2394_s1 + $0x390] sm:$0xff] }
  0x44   :  { %1236 = vmatpush.bf16.msra.mxu2 %v1918_v18  ;;  %1205 = vmatmul.bf16.vlgmr.msrb.gmra.mxu3 %v313_v22  ;;  %v1929_v18 = vld [vmem:[%s2394_s1 + $0x310] sm:$0xff]  ;;  %v1928_v22 = vld [vmem:[%s2394_s1 + $0x308] sm:$0xff] }
  0x45   :  { %1249 = vmatpush.bf16.msra.mxu3 %v1926_v19  ;;  %v1937_v19 = vld [vmem:[%s2394_s1 + $0x350] sm:$0xff] }
  0x46   :  { %1211 = vmatpush.bf16.msra.mxu0 %v1901_v24  ;;  %v20_v24 = vld [vmem:[%s2396_s0 + $0x30] sm:$0xff] }
  0x47   :  { %1224 = vmatpush.bf16.msra.mxu1 %v1909_v25  ;;  %v1944_v25 = vld [vmem:[%s2394_s1 + $0x388] sm:$0xff] }
  0x48   :  { %1237 = vmatpush.bf16.msra.mxu2 %v1917_v26  ;;  %v1952_v26 = vld [vmem:[%s2394_s1 + $0x3c8] sm:$0xff] }
  0x49   :  { %1250 = vmatpush.bf16.msra.mxu3 %v1925_v27  ;;  %v21_v27 = vld [vmem:[%s2396_s0 + $0x38] sm:$0xff] }
  0x4a   :  { %1212 = vmatpush.bf16.msra.mxu0 %v1900_v28  ;;  %v302_v28 = vunpack.c.l.b16 %v20_v24 }
  0x4b   :  { %1225 = vmatpush.bf16.msra.mxu1 %v1908_v29  ;;  %v303_v29 = vunpack.c.h.b16 %v20_v24 }
  0x4c   :  { %1238 = vmatpush.bf16.msra.mxu2 %v1916_v30  ;;  %v1927_v30 = vld [vmem:[%s2394_s1 + $0x300] sm:$0xff] }
  0x4d   :  { %1251 = vmatpush.bf16.msra.mxu3 %v1924_v31  ;;  %v1935_v31 = vld [vmem:[%s2394_s1 + $0x340] sm:$0xff] }
  0x4e   :  { %1213 = vmatpush.bf16.msra.mxu0 %v1899_v32  ;;  %v304_v32 = vunpack.c.l.b16 %v21_v27 }
  0x4f   :  { %1226 = vmatpush.bf16.msra.mxu1 %v1907_v33  ;;  %v305_v33 = vunpack.c.h.b16 %v21_v27 }
  0x50   :  { %1239 = vmatpush.bf16.msra.mxu2 %v1915_v34  ;;  %v1943_v34 = vld [vmem:[%s2394_s1 + $0x380] sm:$0xff] }
  0x51   :  { %1252 = vmatpush.bf16.msra.mxu3 %v1923_v35  ;;  %v1951_v35 = vld [vmem:[%s2394_s1 + $0x3c0] sm:$0xff] }
  0x52   :  { %1214 = vmatpush.bf16.msra.mxu0 %v1898_v36  ;;  %v318_v36 = vpack.c.b16 %v302_v28, %v302_v28 }
  0x53   :  { %1227 = vmatpush.bf16.msra.mxu1 %v1906_v37  ;;  %v319_v37 = vpack.c.b16 %v303_v29, %v303_v29 }
  0x54   :  { %1240 = vmatpush.bf16.msra.mxu2 %v1914_v38  ;;  %v320_v38 = vpack.c.b16 %v304_v32, %v304_v32 }
  0x55   :  { %1253 = vmatpush.bf16.msra.mxu3 %v1922_v39  ;;  %v321_v39 = vpack.c.b16 %v305_v33, %v305_v33 }
  0x56   :  { %1215 = vmatpush.bf16.msra.mxu0 %v1897_v40  ;;  %v1959_v40 = vld [vmem:[%s2395_s2] ss:$0 sm:$0xff] }
  0x57   :  { %1228 = vmatpush.bf16.msra.mxu1 %v1905_v41 }
  0x58   :  { %1241 = vmatpush.bf16.msra.mxu2 %v1913_v42 }
  0x59   :  { %1254 = vmatpush.bf16.msra.mxu3 %v1921_v43 }
  0x5a   :  { %1216 = vmatpush.bf16.msra.mxu0 %v1896_v44 }
  0x5b   :  { %1229 = vmatpush.bf16.msra.mxu1 %v1904_v45 }
  0x5c   :  { %1242 = vmatpush.bf16.msra.mxu2 %v1912_v46 }
  0x5d   :  { %1255 = vmatpush.bf16.msra.mxu3 %v1920_v47 }
  0x5e   :  { %1217 = vmatpush.bf16.msra.mxu0 %v1895_v50 }
  0x5f   :  { %1230 = vmatpush.bf16.msra.mxu1 %v1903_v51 }
  0x60   :  { %1243 = vmatpush.bf16.msra.mxu2 %v1911_v54 }
  0x61   :  { %1256 = vmatpush.bf16.msra.mxu3 %v1919_v55  ;;  %1218 = vmatmul.bf16.vlgmr.msra.gmra.mxu0 %v314_v62 }
  0x62   :  { %1262 = vmatpush.bf16.msrb.mxu0 %v1934_v58  ;;  %1231 = vmatmul.bf16.vlgmr.msra.gmra.mxu1 %v315_v0 }
  0x63   :  { %1275 = vmatpush.bf16.msrb.mxu1 %v1942_v59  ;;  %1244 = vmatmul.bf16.vlgmr.msra.gmra.mxu2 %v316_v63 }
  0x64   :  { %1288 = vmatpush.bf16.msrb.mxu2 %v1950_v60  ;;  %1257 = vmatmul.bf16.vlgmr.msra.gmra.mxu3 %v317_v1 }
  0x65   :  { %1301 = vmatpush.bf16.msrb.mxu3 %v1958_v61 }
  0x66   :  { %1263 = vmatpush.bf16.msrb.mxu0 %v1933_v2 }
  0x67   :  { %1276 = vmatpush.bf16.msrb.mxu1 %v1941_v3 }
  0x68   :  { %1289 = vmatpush.bf16.msrb.mxu2 %v1949_v4 }
  0x69   :  { %1302 = vmatpush.bf16.msrb.mxu3 %v1957_v5 }
  0x6a   :  { %1264 = vmatpush.bf16.msrb.mxu0 %v1932_v6 }
  0x6b   :  { %1277 = vmatpush.bf16.msrb.mxu1 %v1940_v7 }
  0x6c   :  { %1290 = vmatpush.bf16.msrb.mxu2 %v1948_v8 }
  0x6d   :  { %1303 = vmatpush.bf16.msrb.mxu3 %v1956_v9 }
  0x6e   :  { %1265 = vmatpush.bf16.msrb.mxu0 %v1931_v10 }
  0x6f   :  { %1278 = vmatpush.bf16.msrb.mxu1 %v1939_v11 }
  0x70   :  { %1291 = vmatpush.bf16.msrb.mxu2 %v1947_v12 }
  0x71   :  { %1304 = vmatpush.bf16.msrb.mxu3 %v1955_v13 }
  0x72   :  { %1266 = vmatpush.bf16.msrb.mxu0 %v1930_v14 }
  0x73   :  { %1279 = vmatpush.bf16.msrb.mxu1 %v1938_v15 }
  0x74   :  { %1292 = vmatpush.bf16.msrb.mxu2 %v1946_v16 }
  0x75   :  { %1305 = vmatpush.bf16.msrb.mxu3 %v1954_v17 }
  0x76   :  { %1267 = vmatpush.bf16.msrb.mxu0 %v1929_v18 }
  0x77   :  { %1280 = vmatpush.bf16.msrb.mxu1 %v1937_v19 }
  0x78   :  { %1293 = vmatpush.bf16.msrb.mxu2 %v1945_v20 }
  0x79   :  { %1306 = vmatpush.bf16.msrb.mxu3 %v1953_v21 }
  0x7a   :  { %1268 = vmatpush.bf16.msrb.mxu0 %v1928_v22 }
  0x7b   :  { %1281 = vmatpush.bf16.msrb.mxu1 %v1936_v23 }
  0x7c   :  { %1294 = vmatpush.bf16.msrb.mxu2 %v1944_v25 }
  0x7d   :  { %1307 = vmatpush.bf16.msrb.mxu3 %v1952_v26 }
  0x7e   :  { %1269 = vmatpush.bf16.msrb.mxu0 %v1927_v30 }
  0x7f   :  { %1282 = vmatpush.bf16.msrb.mxu1 %v1935_v31 }
  0x80   :  { %1295 = vmatpush.bf16.msrb.mxu2 %v1943_v34 }
  0x81   :  { %1308 = vmatpush.bf16.msrb.mxu3 %v1951_v35  ;;  %1270 = vmatmul.bf16.vlgmr.msrb.gmra.mxu0 %v318_v36 }
  0x82   :  { %1283 = vmatmul.bf16.vlgmr.msrb.gmra.mxu1 %v319_v37 }
  0x83   :  { %1296 = vmatmul.bf16.vlgmr.msrb.gmra.mxu2 %v320_v38 }
  0x84   :  { %1309 = vmatmul.bf16.vlgmr.msrb.gmra.mxu3 %v321_v39 }
  0x9e   :  { %v1115_v41 = vpop.f32.mrf.mxu0 }
  0x9f   :  { %v1116_v42 = vadd.f32 %v1959_v40, %v1115_v41  ;;  %v1128_v43 = vpop.f32.mrf.mxu1 }
  0xa1   :  { %v1129_v44 = vadd.f32 %v1128_v43, %v1116_v42 }
  0xa6   :  { %v1141_v45 = vpop.f32.mrf.mxu2  ;;  %v1117_v48 = vpop.f32.mrf.mxu0 }
  0xa7   :  { %v1142_v46 = vadd.f32 %v1141_v45, %v1129_v44  ;;  %v1154_v47 = vpop.f32.mrf.mxu3  ;;  %v1130_v50 = vpop.f32.mrf.mxu1 }
  0xa9   :  { %v1155_v49 = vadd.f32 %v1154_v47, %v1142_v46 }
  0xae   :  { %v1143_v51 = vpop.f32.mrf.mxu2 }
  0xaf   :  { %v1156_v52 = vpop.f32.mrf.mxu3 }
  0xbe   :  { %v1167_v53 = vpop.f32.mrf.mxu0 }
  0xbf   :  { %v1180_v54 = vpop.f32.mrf.mxu1  ;;  %v1168_v63 = vadd.f32 %v1167_v53, %v1155_v49 }
  0xc1   :  { %v1181_v3 = vadd.f32 %v1180_v54, %v1168_v63 }
  0xc6   :  { %v1193_v55 = vpop.f32.mrf.mxu2  ;;  %v1169_v57 = vpop.f32.mrf.mxu0 }
  0xc7   :  { %v1206_v56 = vpop.f32.mrf.mxu3  ;;  %v1182_v58 = vpop.f32.mrf.mxu1  ;;  %v1194_v5 = vadd.f32 %v1193_v55, %v1181_v3 }
  0xc9   :  { %v1207_v8 = vadd.f32 %v1206_v56, %v1194_v5 }
  0xce   :  { %v1195_v59 = vpop.f32.mrf.mxu2 }
  0xcf   :  { %v1208_v60 = vpop.f32.mrf.mxu3 }
  0xde   :  { %v1219_v61 = vpop.f32.mrf.mxu0 }
  0xdf   :  { %v1232_v62 = vpop.f32.mrf.mxu1  ;;  %v1220_v9 = vadd.f32 %v1219_v61, %v1207_v8 }
  0xe1   :  { %v1233_v10 = vadd.f32 %v1232_v62, %v1220_v9 }
  0xe6   :  { %v1245_v0 = vpop.f32.mrf.mxu2  ;;  %v1221_v2 = vpop.f32.mrf.mxu0 }
  0xe7   :  { %v1258_v1 = vpop.f32.mrf.mxu3  ;;  %v1234_v4 = vpop.f32.mrf.mxu1  ;;  %v1246_v11 = vadd.f32 %v1245_v0, %v1233_v10 }
  0xe9   :  { %v1259_v12 = vadd.f32 %v1258_v1, %v1246_v11 }
  0xee   :  { %v1247_v6 = vpop.f32.mrf.mxu2 }
  0xef   :  { %v1260_v7 = vpop.f32.mrf.mxu3 }
  0xfe   :  { %v1271_v13 = vpop.f32.mrf.mxu0 }
  0xff   :  { %v1284_v14 = vpop.f32.mrf.mxu1  ;;  %v1272_v15 = vadd.f32 %v1271_v13, %v1259_v12 }
 0x101   :  { %v1285_v16 = vadd.f32 %v1284_v14, %v1272_v15 }
 0x106   :  { %v1297_v17 = vpop.f32.mrf.mxu2  ;;  %v1273_v20 = vpop.f32.mrf.mxu0 }
 0x107   :  { %v1310_v18 = vpop.f32.mrf.mxu3  ;;  %v1298_v19 = vadd.f32 %v1297_v17, %v1285_v16  ;;  %v1286_v21 = vpop.f32.mrf.mxu1 }
 0x109   :  { %v1311_v22 = vadd.f32 %v1310_v18, %v1298_v19 }
 0x10b   :  { %1314 = vst [vmem:[%s2397_s3] sm:$0xff] %v1311_v22 }
 0x10e   :  { %v1299_v23 = vpop.f32.mrf.mxu2 }
 0x10f   :  { %v1312_v24 = vpop.f32.mrf.mxu3 }

</bundles_post_ra>
